<compile_context>
chip_gen: v7x
topology: tpu7x:2x2x1
jax: 0.10.0
libtpu: 0.0.40
codegen_flags: <defaults>
</compile_context>

<pallas_src>
import functools

import jax
import jax.numpy as jnp
from jax import lax
from jax.experimental import pallas as pl
from jax.experimental.pallas import tpu as pltpu

EPS = 1e-9
GAMMA = 0.3


def _spectrogram_loss_kernel(o_ref, t_ref, wc_ref, ws_ref, loss_ref, *,
                             tile_f, hop, n_overlap, n_frames, inv_norm):
    """One (batch, frame_tile) grid step of the spectrogram loss.

    o_ref, t_ref : (n_hops_pad, hop) f32  hop-sized blocks of the waveforms
    wc_ref       : (cs, fp)          f32  cos DFT basis (freq zero-padded)
    ws_ref       : (cs, fp)          f32  -sin DFT basis
    loss_ref     : (1, 128)          f32  per-batch loss accumulator
    """
    j = pl.program_id(1)

    @pl.when(j == 0)
    def _init():
        loss_ref[...] = jnp.zeros_like(loss_ref)

    start = pl.multiple_of(j * tile_f, tile_f)
    fp = wc_ref.shape[1]

    def framed_dft_mag(x_ref):
        re = jnp.zeros((tile_f, fp), jnp.float32)
        im = jnp.zeros((tile_f, fp), jnp.float32)
        # Frame f = concat(hops[f], hops[f+1], ..., hops[f+n_overlap-1]);
        # by linearity its DFT is the sum of hop-block matmuls against the
        # matching row-slices of the DFT bases.
        for k in range(n_overlap):
            xk = x_ref[pl.ds(start + k, tile_f), :].astype(jnp.float32)
            re = re + jnp.dot(xk, wc_ref[k * hop:(k + 1) * hop, :],
                              preferred_element_type=jnp.float32)
            im = im + jnp.dot(xk, ws_ref[k * hop:(k + 1) * hop, :],
                              preferred_element_type=jnp.float32)
        mag = jnp.sqrt(re * re + im * im)
        return jnp.maximum(mag, EPS)

    mag_o = framed_dft_mag(o_ref)
    mag_t = framed_dft_mag(t_ref)

    # mag ** GAMMA via exp/log (mag >= EPS > 0).  Zero-padded freq columns and
    # fully-zero padded frames give identical mags for output/target, so their
    # distance is exactly 0; partially padded tail frames are masked below.
    dist = jnp.exp(GAMMA * jnp.log(mag_t)) - jnp.exp(GAMMA * jnp.log(mag_o))
    sq = dist * dist
    frame_idx = start + lax.broadcasted_iota(jnp.int32, (tile_f, fp), 0)
    sq = jnp.where(frame_idx < n_frames, sq, 0.0)

    loss_ref[...] += jnp.sum(sq) * inv_norm


def _spectrogram_loss_per_scale(output, target, chunk_size):
    """SpectrogramLoss with reduction=Identity: per-batch-element loss [B]."""
    B, T = output.shape
    cs = int(chunk_size)
    assert cs % 4 == 0, "chunk_size must be divisible by 4 (hop = chunk_size // 4)"
    hop = cs // 4
    n_overlap = cs // hop                      # = 4
    assert T >= cs, "signal shorter than chunk_size"
    n_frames = (T - cs) // hop + 1             # torch.stft, center=False
    n_freq = cs // 2 + 1                       # onesided
    fp = ((n_freq + 127) // 128) * 128         # lane-dense padded freq axis

    tile_f = min(256, ((n_frames + 7) // 8) * 8)
    n_tiles = pl.cdiv(n_frames, tile_f)
    n_hops_pad = n_tiles * tile_f + (n_overlap - 1)
    t_need = n_hops_pad * hop

    def to_hops(x):
        x = x[:, :min(T, t_need)].astype(jnp.float32)
        pad = t_need - x.shape[1]
        if pad > 0:
            x = jnp.pad(x, ((0, 0), (0, pad)))
        return x.reshape(B, n_hops_pad, hop)

    o_hops = to_hops(output)
    t_hops = to_hops(target)

    # Real-DFT bases (rectangular window, onesided).  Reduce n*f mod cs in
    # int32 before the trig so angles stay accurate for large chunk sizes.
    n = jnp.arange(cs, dtype=jnp.int32)[:, None]
    f = jnp.arange(n_freq, dtype=jnp.int32)[None, :]
    ang = (2.0 * jnp.pi / cs) * ((n * f) % cs).astype(jnp.float32)
    wc = jnp.zeros((cs, fp), jnp.float32).at[:, :n_freq].set(jnp.cos(ang))
    ws = jnp.zeros((cs, fp), jnp.float32).at[:, :n_freq].set(-jnp.sin(ang))

    kernel = functools.partial(
        _spectrogram_loss_kernel,
        tile_f=tile_f, hop=hop, n_overlap=n_overlap,
        n_frames=n_frames, inv_norm=1.0 / (n_frames * n_freq))

    loss = pl.pallas_call(
        kernel,
        out_shape=jax.ShapeDtypeStruct((B, 1, 128), jnp.float32),
        grid_spec=pltpu.PrefetchScalarGridSpec(
            num_scalar_prefetch=0,
            grid=(B, n_tiles),
            in_specs=[
                pl.BlockSpec((None, n_hops_pad, hop), lambda b, j: (b, 0, 0)),
                pl.BlockSpec((None, n_hops_pad, hop), lambda b, j: (b, 0, 0)),
                pl.BlockSpec((cs, fp), lambda b, j: (0, 0)),
                pl.BlockSpec((cs, fp), lambda b, j: (0, 0)),
            ],
            out_specs=pl.BlockSpec((None, 1, 128), lambda b, j: (b, 0, 0)),
        ),
        compiler_params=pltpu.CompilerParams(
            dimension_semantics=("parallel", "arbitrary"),
            vmem_limit_bytes=64 * 1024 * 1024,   # stay under v7x's 64 MiB VMEM
        ),
    )(o_hops, t_hops, wc, ws)

    return loss[:, 0, 0]                        # (B,)


@functools.partial(jax.jit, static_argnames=("chunk_sizes",))
def multiscale_spectrogram_loss(output, target, chunk_sizes):
    """MultiscaleSpectrogramLoss.forward (out_dict=False equivalent) -> scalar."""
    per_scale = [_spectrogram_loss_per_scale(output, target, cs)
                 for cs in chunk_sizes]
    loss_per_element = jnp.mean(jnp.stack(per_scale), axis=0)   # [B]
    return jnp.mean(loss_per_element)                            # scalar


def _reference(output, target, chunk_sizes):
    """Pure-JAX reference mirroring the PyTorch module (rfft-based STFT)."""
    B, T = output.shape
    per_scale = []
    for cs in chunk_sizes:
        hop = cs // 4
        n_frames = (T - cs) // hop + 1
        idx = jnp.arange(n_frames)[:, None] * hop + jnp.arange(cs)[None, :]

        def mag(x):
            frames = x[:, idx]                               # (B, n_frames, cs)
            st = jnp.fft.rfft(frames.astype(jnp.float32), axis=-1)
            return jnp.maximum(jnp.abs(st), EPS)

        mo, mt = mag(output), mag(target)
        dist = mt ** GAMMA - mo ** GAMMA
        loss_per_chunk = jnp.mean(dist ** 2, axis=-1)        # mean over freq
        per_scale.append(jnp.mean(loss_per_chunk, axis=-1))  # mean over frames
    loss_per_element = jnp.mean(jnp.stack(per_scale), axis=0)
    return jnp.mean(loss_per_element)


if __name__ == "__main__":
    key = jax.random.PRNGKey(0)
    k1, k2 = jax.random.split(key)

    B, T = 2, 400                 # small waveform batch; T exercises tail masking
    chunk_sizes = (32, 64)        # multiscale n_fft sizes (hop = n_fft // 4)

    output = jax.random.normal(k1, (B, T), dtype=jnp.float32)
    target = jax.random.normal(k2, (B, T), dtype=jnp.float32)

    loss = multiscale_spectrogram_loss(output, target, chunk_sizes)
    loss = jax.block_until_ready(loss)

    ref = _reference(output, target, chunk_sizes)
    assert jnp.allclose(loss, ref, atol=1e-5, rtol=1e-4), (loss, ref)

    print("KERNEL_OK")
</pallas_src>

<mosaic_0001>
module attributes {stable_mosaic.version = 11 : i64} {
  func.func @_spectrogram_loss_kernel(%arg0: i32, %arg1: i32, %arg2: memref<1x51x8xf32, #tpu.memory_space<vmem>>, %arg3: memref<1x51x8xf32, #tpu.memory_space<vmem>>, %arg4: memref<32x128xf32, #tpu.memory_space<vmem>>, %arg5: memref<32x128xf32, #tpu.memory_space<vmem>>, %arg6: memref<1x1x128xf32, #tpu.memory_space<vmem>>) attributes {dimension_semantics = [#tpu.dimension_semantics<parallel>, #tpu.dimension_semantics<arbitrary>], iteration_bounds = array<i64: 2, 1>, scalar_prefetch = 0 : i64, scratch_operands = 0 : i64, tpu.core_type = #tpu.core_type<tc>, window_params = [{transform_indices = @transform_0, window_bounds = array<i64: 1, 51, 8>}, {transform_indices = @transform_1, window_bounds = array<i64: 1, 51, 8>}, {pipeline_mode = #tpu.pipeline_mode<synchronous>, transform_indices = @transform_2, window_bounds = array<i64: 32, 128>}, {pipeline_mode = #tpu.pipeline_mode<synchronous>, transform_indices = @transform_3, window_bounds = array<i64: 32, 128>}, {transform_indices = @transform_4, window_bounds = array<i64: 1, 1, 128>}]} {
    %c0_i32 = arith.constant 0 : i32
    %0 = arith.cmpi eq, %arg1, %c0_i32 : i32
    %1 = arith.extui %0 : i1 to i32
    %c0_i32_0 = arith.constant 0 : i32
    %2 = arith.cmpi ne, %1, %c0_i32_0 : i32
    scf.if %2 {
      %cst_82 = arith.constant 0.000000e+00 : f32
      %130 = vector.broadcast %cst_82 : f32 to vector<1x128xf32>
      %c0_83 = arith.constant 0 : index
      %c0_84 = arith.constant 0 : index
      %c0_85 = arith.constant 0 : index
      %131 = vector.load %arg6[%c0_83, %c0_84, %c0_85] : memref<1x1x128xf32, #tpu.memory_space<vmem>>, vector<1x1x128xf32>
      %132 = vector.shape_cast %131 : vector<1x1x128xf32> to vector<1x128xf32>
      %133 = vector.shape_cast %130 : vector<1x128xf32> to vector<1x1x128xf32>
      tpu.vector_store %arg6[%c0_83, %c0_84, %c0_85], %133 {strides = array<i32>} : memref<1x1x128xf32, #tpu.memory_space<vmem>>, vector<1x1x128xf32>,
    } else {
    }
    %c48_i32 = arith.constant 48 : i32
    %3 = arith.muli %arg1, %c48_i32 : i32
    %4 = tpu.assume_multiple %3, 48 : i32
    %cst = arith.constant 0.000000e+00 : f32
    %5 = vector.broadcast %cst : f32 to vector<48x128xf32>
    %cst_1 = arith.constant 0.000000e+00 : f32
    %6 = vector.broadcast %cst_1 : f32 to vector<48x128xf32>
    %c0_i32_2 = arith.constant 0 : i32
    %7 = arith.addi %4, %c0_i32_2 : i32
    %c0 = arith.constant 0 : index
    %8 = arith.index_cast %7 : i32 to index
    %c0_3 = arith.constant 0 : index
    %9 = vector.load %arg2[%c0, %8, %c0_3] : memref<1x51x8xf32, #tpu.memory_space<vmem>>, vector<1x48x8xf32>
    %10 = vector.shape_cast %9 : vector<1x48x8xf32> to vector<48x8xf32>
    %c0_4 = arith.constant 0 : index
    %c0_5 = arith.constant 0 : index
    %11 = vector.load %arg4[%c0_4, %c0_5] : memref<32x128xf32, #tpu.memory_space<vmem>>, vector<8x128xf32>
    %cst_6 = arith.constant dense<0.000000e+00> : vector<48x128xf32>
    %12 = tpu.matmul %10, %11, %cst_6 {dimension_numbers = #tpu.dot_dimension_numbers<[1], [0], [0], [1], [0, 0, 1, 1], [], []>} : vector<48x8xf32>, vector<8x128xf32>, vector<48x128xf32> -> vector<48x128xf32>
    %13 = arith.addf %5, %12 : vector<48x128xf32>
    %c0_7 = arith.constant 0 : index
    %c0_8 = arith.constant 0 : index
    %14 = vector.load %arg5[%c0_7, %c0_8] : memref<32x128xf32, #tpu.memory_space<vmem>>, vector<8x128xf32>
    %cst_9 = arith.constant dense<0.000000e+00> : vector<48x128xf32>
    %15 = tpu.matmul %10, %14, %cst_9 {dimension_numbers = #tpu.dot_dimension_numbers<[1], [0], [0], [1], [0, 0, 1, 1], [], []>} : vector<48x8xf32>, vector<8x128xf32>, vector<48x128xf32> -> vector<48x128xf32>
    %16 = arith.addf %6, %15 : vector<48x128xf32>
    %c1_i32 = arith.constant 1 : i32
    %17 = arith.addi %4, %c1_i32 : i32
    %c0_10 = arith.constant 0 : index
    %18 = arith.index_cast %17 : i32 to index
    %c0_11 = arith.constant 0 : index
    %19 = vector.load %arg2[%c0_10, %18, %c0_11] : memref<1x51x8xf32, #tpu.memory_space<vmem>>, vector<1x48x8xf32>
    %20 = vector.shape_cast %19 : vector<1x48x8xf32> to vector<48x8xf32>
    %c8 = arith.constant 8 : index
    %c0_12 = arith.constant 0 : index
    %21 = vector.load %arg4[%c8, %c0_12] : memref<32x128xf32, #tpu.memory_space<vmem>>, vector<8x128xf32>
    %cst_13 = arith.constant dense<0.000000e+00> : vector<48x128xf32>
    %22 = tpu.matmul %20, %21, %cst_13 {dimension_numbers = #tpu.dot_dimension_numbers<[1], [0], [0], [1], [0, 0, 1, 1], [], []>} : vector<48x8xf32>, vector<8x128xf32>, vector<48x128xf32> -> vector<48x128xf32>
    %23 = arith.addf %13, %22 : vector<48x128xf32>
    %c8_14 = arith.constant 8 : index
    %c0_15 = arith.constant 0 : index
    %24 = vector.load %arg5[%c8_14, %c0_15] : memref<32x128xf32, #tpu.memory_space<vmem>>, vector<8x128xf32>
    %cst_16 = arith.constant dense<0.000000e+00> : vector<48x128xf32>
    %25 = tpu.matmul %20, %24, %cst_16 {dimension_numbers = #tpu.dot_dimension_numbers<[1], [0], [0], [1], [0, 0, 1, 1], [], []>} : vector<48x8xf32>, vector<8x128xf32>, vector<48x128xf32> -> vector<48x128xf32>
    %26 = arith.addf %16, %25 : vector<48x128xf32>
    %c2_i32 = arith.constant 2 : i32
    %27 = arith.addi %4, %c2_i32 : i32
    %c0_17 = arith.constant 0 : index
    %28 = arith.index_cast %27 : i32 to index
    %c0_18 = arith.constant 0 : index
    %29 = vector.load %arg2[%c0_17, %28, %c0_18] : memref<1x51x8xf32, #tpu.memory_space<vmem>>, vector<1x48x8xf32>
    %30 = vector.shape_cast %29 : vector<1x48x8xf32> to vector<48x8xf32>
    %c16 = arith.constant 16 : index
    %c0_19 = arith.constant 0 : index
    %31 = vector.load %arg4[%c16, %c0_19] : memref<32x128xf32, #tpu.memory_space<vmem>>, vector<8x128xf32>
    %cst_20 = arith.constant dense<0.000000e+00> : vector<48x128xf32>
    %32 = tpu.matmul %30, %31, %cst_20 {dimension_numbers = #tpu.dot_dimension_numbers<[1], [0], [0], [1], [0, 0, 1, 1], [], []>} : vector<48x8xf32>, vector<8x128xf32>, vector<48x128xf32> -> vector<48x128xf32>
    %33 = arith.addf %23, %32 : vector<48x128xf32>
    %c16_21 = arith.constant 16 : index
    %c0_22 = arith.constant 0 : index
    %34 = vector.load %arg5[%c16_21, %c0_22] : memref<32x128xf32, #tpu.memory_space<vmem>>, vector<8x128xf32>
    %cst_23 = arith.constant dense<0.000000e+00> : vector<48x128xf32>
    %35 = tpu.matmul %30, %34, %cst_23 {dimension_numbers = #tpu.dot_dimension_numbers<[1], [0], [0], [1], [0, 0, 1, 1], [], []>} : vector<48x8xf32>, vector<8x128xf32>, vector<48x128xf32> -> vector<48x128xf32>
    %36 = arith.addf %26, %35 : vector<48x128xf32>
    %c3_i32 = arith.constant 3 : i32
    %37 = arith.addi %4, %c3_i32 : i32
    %c0_24 = arith.constant 0 : index
    %38 = arith.index_cast %37 : i32 to index
    %c0_25 = arith.constant 0 : index
    %39 = vector.load %arg2[%c0_24, %38, %c0_25] : memref<1x51x8xf32, #tpu.memory_space<vmem>>, vector<1x48x8xf32>
    %40 = vector.shape_cast %39 : vector<1x48x8xf32> to vector<48x8xf32>
    %c24 = arith.constant 24 : index
    %c0_26 = arith.constant 0 : index
    %41 = vector.load %arg4[%c24, %c0_26] : memref<32x128xf32, #tpu.memory_space<vmem>>, vector<8x128xf32>
    %cst_27 = arith.constant dense<0.000000e+00> : vector<48x128xf32>
    %42 = tpu.matmul %40, %41, %cst_27 {dimension_numbers = #tpu.dot_dimension_numbers<[1], [0], [0], [1], [0, 0, 1, 1], [], []>} : vector<48x8xf32>, vector<8x128xf32>, vector<48x128xf32> -> vector<48x128xf32>
    %43 = arith.addf %33, %42 : vector<48x128xf32>
    %c24_28 = arith.constant 24 : index
    %c0_29 = arith.constant 0 : index
    %44 = vector.load %arg5[%c24_28, %c0_29] : memref<32x128xf32, #tpu.memory_space<vmem>>, vector<8x128xf32>
    %cst_30 = arith.constant dense<0.000000e+00> : vector<48x128xf32>
    %45 = tpu.matmul %40, %44, %cst_30 {dimension_numbers = #tpu.dot_dimension_numbers<[1], [0], [0], [1], [0, 0, 1, 1], [], []>} : vector<48x8xf32>, vector<8x128xf32>, vector<48x128xf32> -> vector<48x128xf32>
    %46 = arith.addf %36, %45 : vector<48x128xf32>
    %47 = arith.mulf %43, %43 : vector<48x128xf32>
    %48 = arith.mulf %46, %46 : vector<48x128xf32>
    %49 = arith.addf %47, %48 : vector<48x128xf32>
    %50 = math.sqrt %49 : vector<48x128xf32>
    %cst_31 = arith.constant 9.99999971E-10 : f32
    %51 = vector.broadcast %cst_31 : f32 to vector<48x128xf32>
    %52 = arith.maximumf %50, %51 : vector<48x128xf32>
    %cst_32 = arith.constant 0.000000e+00 : f32
    %53 = vector.broadcast %cst_32 : f32 to vector<48x128xf32>
    %cst_33 = arith.constant 0.000000e+00 : f32
    %54 = vector.broadcast %cst_33 : f32 to vector<48x128xf32>
    %c0_i32_34 = arith.constant 0 : i32
    %55 = arith.addi %4, %c0_i32_34 : i32
    %c0_35 = arith.constant 0 : index
    %56 = arith.index_cast %55 : i32 to index
    %c0_36 = arith.constant 0 : index
    %57 = vector.load %arg3[%c0_35, %56, %c0_36] : memref<1x51x8xf32, #tpu.memory_space<vmem>>, vector<1x48x8xf32>
    %58 = vector.shape_cast %57 : vector<1x48x8xf32> to vector<48x8xf32>
    %c0_37 = arith.constant 0 : index
    %c0_38 = arith.constant 0 : index
    %59 = vector.load %arg4[%c0_37, %c0_38] : memref<32x128xf32, #tpu.memory_space<vmem>>, vector<8x128xf32>
    %cst_39 = arith.constant dense<0.000000e+00> : vector<48x128xf32>
    %60 = tpu.matmul %58, %59, %cst_39 {dimension_numbers = #tpu.dot_dimension_numbers<[1], [0], [0], [1], [0, 0, 1, 1], [], []>} : vector<48x8xf32>, vector<8x128xf32>, vector<48x128xf32> -> vector<48x128xf32>
    %61 = arith.addf %53, %60 : vector<48x128xf32>
    %c0_40 = arith.constant 0 : index
    %c0_41 = arith.constant 0 : index
    %62 = vector.load %arg5[%c0_40, %c0_41] : memref<32x128xf32, #tpu.memory_space<vmem>>, vector<8x128xf32>
    %cst_42 = arith.constant dense<0.000000e+00> : vector<48x128xf32>
    %63 = tpu.matmul %58, %62, %cst_42 {dimension_numbers = #tpu.dot_dimension_numbers<[1], [0], [0], [1], [0, 0, 1, 1], [], []>} : vector<48x8xf32>, vector<8x128xf32>, vector<48x128xf32> -> vector<48x128xf32>
    %64 = arith.addf %54, %63 : vector<48x128xf32>
    %c1_i32_43 = arith.constant 1 : i32
    %65 = arith.addi %4, %c1_i32_43 : i32
    %c0_44 = arith.constant 0 : index
    %66 = arith.index_cast %65 : i32 to index
    %c0_45 = arith.constant 0 : index
    %67 = vector.load %arg3[%c0_44, %66, %c0_45] : memref<1x51x8xf32, #tpu.memory_space<vmem>>, vector<1x48x8xf32>
    %68 = vector.shape_cast %67 : vector<1x48x8xf32> to vector<48x8xf32>
    %c8_46 = arith.constant 8 : index
    %c0_47 = arith.constant 0 : index
    %69 = vector.load %arg4[%c8_46, %c0_47] : memref<32x128xf32, #tpu.memory_space<vmem>>, vector<8x128xf32>
    %cst_48 = arith.constant dense<0.000000e+00> : vector<48x128xf32>
    %70 = tpu.matmul %68, %69, %cst_48 {dimension_numbers = #tpu.dot_dimension_numbers<[1], [0], [0], [1], [0, 0, 1, 1], [], []>} : vector<48x8xf32>, vector<8x128xf32>, vector<48x128xf32> -> vector<48x128xf32>
    %71 = arith.addf %61, %70 : vector<48x128xf32>
    %c8_49 = arith.constant 8 : index
    %c0_50 = arith.constant 0 : index
    %72 = vector.load %arg5[%c8_49, %c0_50] : memref<32x128xf32, #tpu.memory_space<vmem>>, vector<8x128xf32>
    %cst_51 = arith.constant dense<0.000000e+00> : vector<48x128xf32>
    %73 = tpu.matmul %68, %72, %cst_51 {dimension_numbers = #tpu.dot_dimension_numbers<[1], [0], [0], [1], [0, 0, 1, 1], [], []>} : vector<48x8xf32>, vector<8x128xf32>, vector<48x128xf32> -> vector<48x128xf32>
    %74 = arith.addf %64, %73 : vector<48x128xf32>
    %c2_i32_52 = arith.constant 2 : i32
    %75 = arith.addi %4, %c2_i32_52 : i32
    %c0_53 = arith.constant 0 : index
    %76 = arith.index_cast %75 : i32 to index
    %c0_54 = arith.constant 0 : index
    %77 = vector.load %arg3[%c0_53, %76, %c0_54] : memref<1x51x8xf32, #tpu.memory_space<vmem>>, vector<1x48x8xf32>
    %78 = vector.shape_cast %77 : vector<1x48x8xf32> to vector<48x8xf32>
    %c16_55 = arith.constant 16 : index
    %c0_56 = arith.constant 0 : index
    %79 = vector.load %arg4[%c16_55, %c0_56] : memref<32x128xf32, #tpu.memory_space<vmem>>, vector<8x128xf32>
    %cst_57 = arith.constant dense<0.000000e+00> : vector<48x128xf32>
    %80 = tpu.matmul %78, %79, %cst_57 {dimension_numbers = #tpu.dot_dimension_numbers<[1], [0], [0], [1], [0, 0, 1, 1], [], []>} : vector<48x8xf32>, vector<8x128xf32>, vector<48x128xf32> -> vector<48x128xf32>
    %81 = arith.addf %71, %80 : vector<48x128xf32>
    %c16_58 = arith.constant 16 : index
    %c0_59 = arith.constant 0 : index
    %82 = vector.load %arg5[%c16_58, %c0_59] : memref<32x128xf32, #tpu.memory_space<vmem>>, vector<8x128xf32>
    %cst_60 = arith.constant dense<0.000000e+00> : vector<48x128xf32>
    %83 = tpu.matmul %78, %82, %cst_60 {dimension_numbers = #tpu.dot_dimension_numbers<[1], [0], [0], [1], [0, 0, 1, 1], [], []>} : vector<48x8xf32>, vector<8x128xf32>, vector<48x128xf32> -> vector<48x128xf32>
    %84 = arith.addf %74, %83 : vector<48x128xf32>
    %c3_i32_61 = arith.constant 3 : i32
    %85 = arith.addi %4, %c3_i32_61 : i32
    %c0_62 = arith.constant 0 : index
    %86 = arith.index_cast %85 : i32 to index
    %c0_63 = arith.constant 0 : index
    %87 = vector.load %arg3[%c0_62, %86, %c0_63] : memref<1x51x8xf32, #tpu.memory_space<vmem>>, vector<1x48x8xf32>
    %88 = vector.shape_cast %87 : vector<1x48x8xf32> to vector<48x8xf32>
    %c24_64 = arith.constant 24 : index
    %c0_65 = arith.constant 0 : index
    %89 = vector.load %arg4[%c24_64, %c0_65] : memref<32x128xf32, #tpu.memory_space<vmem>>, vector<8x128xf32>
    %cst_66 = arith.constant dense<0.000000e+00> : vector<48x128xf32>
    %90 = tpu.matmul %88, %89, %cst_66 {dimension_numbers = #tpu.dot_dimension_numbers<[1], [0], [0], [1], [0, 0, 1, 1], [], []>} : vector<48x8xf32>, vector<8x128xf32>, vector<48x128xf32> -> vector<48x128xf32>
    %91 = arith.addf %81, %90 : vector<48x128xf32>
    %c24_67 = arith.constant 24 : index
    %c0_68 = arith.constant 0 : index
    %92 = vector.load %arg5[%c24_67, %c0_68] : memref<32x128xf32, #tpu.memory_space<vmem>>, vector<8x128xf32>
    %cst_69 = arith.constant dense<0.000000e+00> : vector<48x128xf32>
    %93 = tpu.matmul %88, %92, %cst_69 {dimension_numbers = #tpu.dot_dimension_numbers<[1], [0], [0], [1], [0, 0, 1, 1], [], []>} : vector<48x8xf32>, vector<8x128xf32>, vector<48x128xf32> -> vector<48x128xf32>
    %94 = arith.addf %84, %93 : vector<48x128xf32>
    %95 = arith.mulf %91, %91 : vector<48x128xf32>
    %96 = arith.mulf %94, %94 : vector<48x128xf32>
    %97 = arith.addf %95, %96 : vector<48x128xf32>
    %98 = math.sqrt %97 : vector<48x128xf32>
    %cst_70 = arith.constant 9.99999971E-10 : f32
    %99 = vector.broadcast %cst_70 : f32 to vector<48x128xf32>
    %100 = arith.maximumf %98, %99 : vector<48x128xf32>
    %101 = math.log %100 : vector<48x128xf32>
    %cst_71 = arith.constant 3.000000e-01 : f32
    %102 = vector.broadcast %cst_71 : f32 to vector<48x128xf32>
    %103 = arith.mulf %102, %101 : vector<48x128xf32>
    %104 = math.exp %103 : vector<48x128xf32>
    %105 = math.log %52 : vector<48x128xf32>
    %cst_72 = arith.constant 3.000000e-01 : f32
    %106 = vector.broadcast %cst_72 : f32 to vector<48x128xf32>
    %107 = arith.mulf %106, %105 : vector<48x128xf32>
    %108 = math.exp %107 : vector<48x128xf32>
    %109 = arith.subf %104, %108 : vector<48x128xf32>
    %110 = arith.mulf %109, %109 : vector<48x128xf32>
    %111 = tpu.iota {dimensions = array<i32: 0>} : vector<48x128xi32>
    %112 = vector.broadcast %4 : i32 to vector<48x128xi32>
    %113 = arith.addi %112, %111 : vector<48x128xi32>
    %c47_i32 = arith.constant 47 : i32
    %114 = vector.broadcast %c47_i32 : i32 to vector<48x128xi32>
    %115 = arith.cmpi slt, %113, %114 : vector<48x128xi32>
    %cst_73 = arith.constant 0.000000e+00 : f32
    %116 = vector.broadcast %cst_73 : f32 to vector<48x128xf32>
    %117 = arith.select %115, %110, %116 : vector<48x128xi1>, vector<48x128xf32>
    %c0_74 = arith.constant 0 : index
    %c0_75 = arith.constant 0 : index
    %c0_76 = arith.constant 0 : index
    %118 = vector.load %arg6[%c0_74, %c0_75, %c0_76] : memref<1x1x128xf32, #tpu.memory_space<vmem>>, vector<1x1x128xf32>
    %119 = vector.shape_cast %118 : vector<1x1x128xf32> to vector<1x128xf32>
    %120 = vector.shape_cast %117 : vector<48x128xf32> to vector<1x48x128xf32>
    %cst_77 = arith.constant dense<0.000000e+00> : vector<1xf32>
    %121 = vector.multi_reduction <add>, %120, %cst_77 [1, 2] : vector<1x48x128xf32> to vector<1xf32>
    %122 = vector.shape_cast %121 : vector<1xf32> to vector<1x1x1xf32>
    %123 = vector.extract %122[0, 0, 0] : f32 from vector<1x1x1xf32>
    %cst_78 = arith.constant 0.00125156448 : f32
    %124 = arith.mulf %123, %cst_78 : f32
    %125 = vector.broadcast %124 : f32 to vector<1x128xf32>
    %126 = arith.addf %119, %125 : vector<1x128xf32>
    %c0_79 = arith.constant 0 : index
    %c0_80 = arith.constant 0 : index
    %c0_81 = arith.constant 0 : index
    %127 = vector.load %arg6[%c0_79, %c0_80, %c0_81] : memref<1x1x128xf32, #tpu.memory_space<vmem>>, vector<1x1x128xf32>
    %128 = vector.shape_cast %127 : vector<1x1x128xf32> to vector<1x128xf32>
    %129 = vector.shape_cast %126 : vector<1x128xf32> to vector<1x1x128xf32>
    tpu.vector_store %arg6[%c0_79, %c0_80, %c0_81], %129 {strides = array<i32>} : memref<1x1x128xf32, #tpu.memory_space<vmem>>, vector<1x1x128xf32>,
    return
  }
  func.func @transform_0(%arg0: i32, %arg1: i32) -> (i32, i32, i32) {
    %c0_i32 = arith.constant 0 : i32
    %c0_i32_0 = arith.constant 0 : i32
    %c0_i32_1 = arith.constant 0 : i32
    return %arg0, %c0_i32, %c0_i32_0 : i32, i32, i32
  }
  func.func @transform_1(%arg0: i32, %arg1: i32) -> (i32, i32, i32) {
    %c0_i32 = arith.constant 0 : i32
    %c0_i32_0 = arith.constant 0 : i32
    %c0_i32_1 = arith.constant 0 : i32
    return %arg0, %c0_i32, %c0_i32_0 : i32, i32, i32
  }
  func.func @transform_2(%arg0: i32, %arg1: i32) -> (i32, i32) {
    %c0_i32 = arith.constant 0 : i32
    %c0_i32_0 = arith.constant 0 : i32
    %c0_i32_1 = arith.constant 0 : i32
    return %c0_i32, %c0_i32_0 : i32, i32
  }
  func.func @transform_3(%arg0: i32, %arg1: i32) -> (i32, i32) {
    %c0_i32 = arith.constant 0 : i32
    %c0_i32_0 = arith.constant 0 : i32
    %c0_i32_1 = arith.constant 0 : i32
    return %c0_i32, %c0_i32_0 : i32, i32
  }
  func.func @transform_4(%arg0: i32, %arg1: i32) -> (i32, i32, i32) {
    %c0_i32 = arith.constant 0 : i32
    %c0_i32_0 = arith.constant 0 : i32
    %c0_i32_1 = arith.constant 0 : i32
    return %arg0, %c0_i32, %c0_i32_0 : i32, i32, i32
  }
}

module attributes {stable_mosaic.version = 11 : i64} {
  func.func @_spectrogram_loss_kernel(%arg0: i32, %arg1: i32, %arg2: memref<1x27x16xf32, #tpu.memory_space<vmem>>, %arg3: memref<1x27x16xf32, #tpu.memory_space<vmem>>, %arg4: memref<64x128xf32, #tpu.memory_space<vmem>>, %arg5: memref<64x128xf32, #tpu.memory_space<vmem>>, %arg6: memref<1x1x128xf32, #tpu.memory_space<vmem>>) attributes {dimension_semantics = [#tpu.dimension_semantics<parallel>, #tpu.dimension_semantics<arbitrary>], iteration_bounds = array<i64: 2, 1>, scalar_prefetch = 0 : i64, scratch_operands = 0 : i64, tpu.core_type = #tpu.core_type<tc>, window_params = [{transform_indices = @transform_0, window_bounds = array<i64: 1, 27, 16>}, {transform_indices = @transform_1, window_bounds = array<i64: 1, 27, 16>}, {pipeline_mode = #tpu.pipeline_mode<synchronous>, transform_indices = @transform_2, window_bounds = array<i64: 64, 128>}, {pipeline_mode = #tpu.pipeline_mode<synchronous>, transform_indices = @transform_3, window_bounds = array<i64: 64, 128>}, {transform_indices = @transform_4, window_bounds = array<i64: 1, 1, 128>}]} {
    %c0_i32 = arith.constant 0 : i32
    %0 = arith.cmpi eq, %arg1, %c0_i32 : i32
    %1 = arith.extui %0 : i1 to i32
    %c0_i32_0 = arith.constant 0 : i32
    %2 = arith.cmpi ne, %1, %c0_i32_0 : i32
    scf.if %2 {
      %cst_82 = arith.constant 0.000000e+00 : f32
      %130 = vector.broadcast %cst_82 : f32 to vector<1x128xf32>
      %c0_83 = arith.constant 0 : index
      %c0_84 = arith.constant 0 : index
      %c0_85 = arith.constant 0 : index
      %131 = vector.load %arg6[%c0_83, %c0_84, %c0_85] : memref<1x1x128xf32, #tpu.memory_space<vmem>>, vector<1x1x128xf32>
      %132 = vector.shape_cast %131 : vector<1x1x128xf32> to vector<1x128xf32>
      %133 = vector.shape_cast %130 : vector<1x128xf32> to vector<1x1x128xf32>
      tpu.vector_store %arg6[%c0_83, %c0_84, %c0_85], %133 {strides = array<i32>} : memref<1x1x128xf32, #tpu.memory_space<vmem>>, vector<1x1x128xf32>,
    } else {
    }
    %c24_i32 = arith.constant 24 : i32
    %3 = arith.muli %arg1, %c24_i32 : i32
    %4 = tpu.assume_multiple %3, 24 : i32
    %cst = arith.constant 0.000000e+00 : f32
    %5 = vector.broadcast %cst : f32 to vector<24x128xf32>
    %cst_1 = arith.constant 0.000000e+00 : f32
    %6 = vector.broadcast %cst_1 : f32 to vector<24x128xf32>
    %c0_i32_2 = arith.constant 0 : i32
    %7 = arith.addi %4, %c0_i32_2 : i32
    %c0 = arith.constant 0 : index
    %8 = arith.index_cast %7 : i32 to index
    %c0_3 = arith.constant 0 : index
    %9 = vector.load %arg2[%c0, %8, %c0_3] : memref<1x27x16xf32, #tpu.memory_space<vmem>>, vector<1x24x16xf32>
    %10 = vector.shape_cast %9 : vector<1x24x16xf32> to vector<24x16xf32>
    %c0_4 = arith.constant 0 : index
    %c0_5 = arith.constant 0 : index
    %11 = vector.load %arg4[%c0_4, %c0_5] : memref<64x128xf32, #tpu.memory_space<vmem>>, vector<16x128xf32>
    %cst_6 = arith.constant dense<0.000000e+00> : vector<24x128xf32>
    %12 = tpu.matmul %10, %11, %cst_6 {dimension_numbers = #tpu.dot_dimension_numbers<[1], [0], [0], [1], [0, 0, 1, 1], [], []>} : vector<24x16xf32>, vector<16x128xf32>, vector<24x128xf32> -> vector<24x128xf32>
    %13 = arith.addf %5, %12 : vector<24x128xf32>
    %c0_7 = arith.constant 0 : index
    %c0_8 = arith.constant 0 : index
    %14 = vector.load %arg5[%c0_7, %c0_8] : memref<64x128xf32, #tpu.memory_space<vmem>>, vector<16x128xf32>
    %cst_9 = arith.constant dense<0.000000e+00> : vector<24x128xf32>
    %15 = tpu.matmul %10, %14, %cst_9 {dimension_numbers = #tpu.dot_dimension_numbers<[1], [0], [0], [1], [0, 0, 1, 1], [], []>} : vector<24x16xf32>, vector<16x128xf32>, vector<24x128xf32> -> vector<24x128xf32>
    %16 = arith.addf %6, %15 : vector<24x128xf32>
    %c1_i32 = arith.constant 1 : i32
    %17 = arith.addi %4, %c1_i32 : i32
    %c0_10 = arith.constant 0 : index
    %18 = arith.index_cast %17 : i32 to index
    %c0_11 = arith.constant 0 : index
    %19 = vector.load %arg2[%c0_10, %18, %c0_11] : memref<1x27x16xf32, #tpu.memory_space<vmem>>, vector<1x24x16xf32>
    %20 = vector.shape_cast %19 : vector<1x24x16xf32> to vector<24x16xf32>
    %c16 = arith.constant 16 : index
    %c0_12 = arith.constant 0 : index
    %21 = vector.load %arg4[%c16, %c0_12] : memref<64x128xf32, #tpu.memory_space<vmem>>, vector<16x128xf32>
    %cst_13 = arith.constant dense<0.000000e+00> : vector<24x128xf32>
    %22 = tpu.matmul %20, %21, %cst_13 {dimension_numbers = #tpu.dot_dimension_numbers<[1], [0], [0], [1], [0, 0, 1, 1], [], []>} : vector<24x16xf32>, vector<16x128xf32>, vector<24x128xf32> -> vector<24x128xf32>
    %23 = arith.addf %13, %22 : vector<24x128xf32>
    %c16_14 = arith.constant 16 : index
    %c0_15 = arith.constant 0 : index
    %24 = vector.load %arg5[%c16_14, %c0_15] : memref<64x128xf32, #tpu.memory_space<vmem>>, vector<16x128xf32>
    %cst_16 = arith.constant dense<0.000000e+00> : vector<24x128xf32>
    %25 = tpu.matmul %20, %24, %cst_16 {dimension_numbers = #tpu.dot_dimension_numbers<[1], [0], [0], [1], [0, 0, 1, 1], [], []>} : vector<24x16xf32>, vector<16x128xf32>, vector<24x128xf32> -> vector<24x128xf32>
    %26 = arith.addf %16, %25 : vector<24x128xf32>
    %c2_i32 = arith.constant 2 : i32
    %27 = arith.addi %4, %c2_i32 : i32
    %c0_17 = arith.constant 0 : index
    %28 = arith.index_cast %27 : i32 to index
    %c0_18 = arith.constant 0 : index
    %29 = vector.load %arg2[%c0_17, %28, %c0_18] : memref<1x27x16xf32, #tpu.memory_space<vmem>>, vector<1x24x16xf32>
    %30 = vector.shape_cast %29 : vector<1x24x16xf32> to vector<24x16xf32>
    %c32 = arith.constant 32 : index
    %c0_19 = arith.constant 0 : index
    %31 = vector.load %arg4[%c32, %c0_19] : memref<64x128xf32, #tpu.memory_space<vmem>>, vector<16x128xf32>
    %cst_20 = arith.constant dense<0.000000e+00> : vector<24x128xf32>
    %32 = tpu.matmul %30, %31, %cst_20 {dimension_numbers = #tpu.dot_dimension_numbers<[1], [0], [0], [1], [0, 0, 1, 1], [], []>} : vector<24x16xf32>, vector<16x128xf32>, vector<24x128xf32> -> vector<24x128xf32>
    %33 = arith.addf %23, %32 : vector<24x128xf32>
    %c32_21 = arith.constant 32 : index
    %c0_22 = arith.constant 0 : index
    %34 = vector.load %arg5[%c32_21, %c0_22] : memref<64x128xf32, #tpu.memory_space<vmem>>, vector<16x128xf32>
    %cst_23 = arith.constant dense<0.000000e+00> : vector<24x128xf32>
    %35 = tpu.matmul %30, %34, %cst_23 {dimension_numbers = #tpu.dot_dimension_numbers<[1], [0], [0], [1], [0, 0, 1, 1], [], []>} : vector<24x16xf32>, vector<16x128xf32>, vector<24x128xf32> -> vector<24x128xf32>
    %36 = arith.addf %26, %35 : vector<24x128xf32>
    %c3_i32 = arith.constant 3 : i32
    %37 = arith.addi %4, %c3_i32 : i32
    %c0_24 = arith.constant 0 : index
    %38 = arith.index_cast %37 : i32 to index
    %c0_25 = arith.constant 0 : index
    %39 = vector.load %arg2[%c0_24, %38, %c0_25] : memref<1x27x16xf32, #tpu.memory_space<vmem>>, vector<1x24x16xf32>
    %40 = vector.shape_cast %39 : vector<1x24x16xf32> to vector<24x16xf32>
    %c48 = arith.constant 48 : index
    %c0_26 = arith.constant 0 : index
    %41 = vector.load %arg4[%c48, %c0_26] : memref<64x128xf32, #tpu.memory_space<vmem>>, vector<16x128xf32>
    %cst_27 = arith.constant dense<0.000000e+00> : vector<24x128xf32>
    %42 = tpu.matmul %40, %41, %cst_27 {dimension_numbers = #tpu.dot_dimension_numbers<[1], [0], [0], [1], [0, 0, 1, 1], [], []>} : vector<24x16xf32>, vector<16x128xf32>, vector<24x128xf32> -> vector<24x128xf32>
    %43 = arith.addf %33, %42 : vector<24x128xf32>
    %c48_28 = arith.constant 48 : index
    %c0_29 = arith.constant 0 : index
    %44 = vector.load %arg5[%c48_28, %c0_29] : memref<64x128xf32, #tpu.memory_space<vmem>>, vector<16x128xf32>
    %cst_30 = arith.constant dense<0.000000e+00> : vector<24x128xf32>
    %45 = tpu.matmul %40, %44, %cst_30 {dimension_numbers = #tpu.dot_dimension_numbers<[1], [0], [0], [1], [0, 0, 1, 1], [], []>} : vector<24x16xf32>, vector<16x128xf32>, vector<24x128xf32> -> vector<24x128xf32>
    %46 = arith.addf %36, %45 : vector<24x128xf32>
    %47 = arith.mulf %43, %43 : vector<24x128xf32>
    %48 = arith.mulf %46, %46 : vector<24x128xf32>
    %49 = arith.addf %47, %48 : vector<24x128xf32>
    %50 = math.sqrt %49 : vector<24x128xf32>
    %cst_31 = arith.constant 9.99999971E-10 : f32
    %51 = vector.broadcast %cst_31 : f32 to vector<24x128xf32>
    %52 = arith.maximumf %50, %51 : vector<24x128xf32>
    %cst_32 = arith.constant 0.000000e+00 : f32
    %53 = vector.broadcast %cst_32 : f32 to vector<24x128xf32>
    %cst_33 = arith.constant 0.000000e+00 : f32
    %54 = vector.broadcast %cst_33 : f32 to vector<24x128xf32>
    %c0_i32_34 = arith.constant 0 : i32
    %55 = arith.addi %4, %c0_i32_34 : i32
    %c0_35 = arith.constant 0 : index
    %56 = arith.index_cast %55 : i32 to index
    %c0_36 = arith.constant 0 : index
    %57 = vector.load %arg3[%c0_35, %56, %c0_36] : memref<1x27x16xf32, #tpu.memory_space<vmem>>, vector<1x24x16xf32>
    %58 = vector.shape_cast %57 : vector<1x24x16xf32> to vector<24x16xf32>
    %c0_37 = arith.constant 0 : index
    %c0_38 = arith.constant 0 : index
    %59 = vector.load %arg4[%c0_37, %c0_38] : memref<64x128xf32, #tpu.memory_space<vmem>>, vector<16x128xf32>
    %cst_39 = arith.constant dense<0.000000e+00> : vector<24x128xf32>
    %60 = tpu.matmul %58, %59, %cst_39 {dimension_numbers = #tpu.dot_dimension_numbers<[1], [0], [0], [1], [0, 0, 1, 1], [], []>} : vector<24x16xf32>, vector<16x128xf32>, vector<24x128xf32> -> vector<24x128xf32>
    %61 = arith.addf %53, %60 : vector<24x128xf32>
    %c0_40 = arith.constant 0 : index
    %c0_41 = arith.constant 0 : index
    %62 = vector.load %arg5[%c0_40, %c0_41] : memref<64x128xf32, #tpu.memory_space<vmem>>, vector<16x128xf32>
    %cst_42 = arith.constant dense<0.000000e+00> : vector<24x128xf32>
    %63 = tpu.matmul %58, %62, %cst_42 {dimension_numbers = #tpu.dot_dimension_numbers<[1], [0], [0], [1], [0, 0, 1, 1], [], []>} : vector<24x16xf32>, vector<16x128xf32>, vector<24x128xf32> -> vector<24x128xf32>
    %64 = arith.addf %54, %63 : vector<24x128xf32>
    %c1_i32_43 = arith.constant 1 : i32
    %65 = arith.addi %4, %c1_i32_43 : i32
    %c0_44 = arith.constant 0 : index
    %66 = arith.index_cast %65 : i32 to index
    %c0_45 = arith.constant 0 : index
    %67 = vector.load %arg3[%c0_44, %66, %c0_45] : memref<1x27x16xf32, #tpu.memory_space<vmem>>, vector<1x24x16xf32>
    %68 = vector.shape_cast %67 : vector<1x24x16xf32> to vector<24x16xf32>
    %c16_46 = arith.constant 16 : index
    %c0_47 = arith.constant 0 : index
    %69 = vector.load %arg4[%c16_46, %c0_47] : memref<64x128xf32, #tpu.memory_space<vmem>>, vector<16x128xf32>
    %cst_48 = arith.constant dense<0.000000e+00> : vector<24x128xf32>
    %70 = tpu.matmul %68, %69, %cst_48 {dimension_numbers = #tpu.dot_dimension_numbers<[1], [0], [0], [1], [0, 0, 1, 1], [], []>} : vector<24x16xf32>, vector<16x128xf32>, vector<24x128xf32> -> vector<24x128xf32>
    %71 = arith.addf %61, %70 : vector<24x128xf32>
    %c16_49 = arith.constant 16 : index
    %c0_50 = arith.constant 0 : index
    %72 = vector.load %arg5[%c16_49, %c0_50] : memref<64x128xf32, #tpu.memory_space<vmem>>, vector<16x128xf32>
    %cst_51 = arith.constant dense<0.000000e+00> : vector<24x128xf32>
    %73 = tpu.matmul %68, %72, %cst_51 {dimension_numbers = #tpu.dot_dimension_numbers<[1], [0], [0], [1], [0, 0, 1, 1], [], []>} : vector<24x16xf32>, vector<16x128xf32>, vector<24x128xf32> -> vector<24x128xf32>
    %74 = arith.addf %64, %73 : vector<24x128xf32>
    %c2_i32_52 = arith.constant 2 : i32
    %75 = arith.addi %4, %c2_i32_52 : i32
    %c0_53 = arith.constant 0 : index
    %76 = arith.index_cast %75 : i32 to index
    %c0_54 = arith.constant 0 : index
    %77 = vector.load %arg3[%c0_53, %76, %c0_54] : memref<1x27x16xf32, #tpu.memory_space<vmem>>, vector<1x24x16xf32>
    %78 = vector.shape_cast %77 : vector<1x24x16xf32> to vector<24x16xf32>
    %c32_55 = arith.constant 32 : index
    %c0_56 = arith.constant 0 : index
    %79 = vector.load %arg4[%c32_55, %c0_56] : memref<64x128xf32, #tpu.memory_space<vmem>>, vector<16x128xf32>
    %cst_57 = arith.constant dense<0.000000e+00> : vector<24x128xf32>
    %80 = tpu.matmul %78, %79, %cst_57 {dimension_numbers = #tpu.dot_dimension_numbers<[1], [0], [0], [1], [0, 0, 1, 1], [], []>} : vector<24x16xf32>, vector<16x128xf32>, vector<24x128xf32> -> vector<24x128xf32>
    %81 = arith.addf %71, %80 : vector<24x128xf32>
    %c32_58 = arith.constant 32 : index
    %c0_59 = arith.constant 0 : index
    %82 = vector.load %arg5[%c32_58, %c0_59] : memref<64x128xf32, #tpu.memory_space<vmem>>, vector<16x128xf32>
    %cst_60 = arith.constant dense<0.000000e+00> : vector<24x128xf32>
    %83 = tpu.matmul %78, %82, %cst_60 {dimension_numbers = #tpu.dot_dimension_numbers<[1], [0], [0], [1], [0, 0, 1, 1], [], []>} : vector<24x16xf32>, vector<16x128xf32>, vector<24x128xf32> -> vector<24x128xf32>
    %84 = arith.addf %74, %83 : vector<24x128xf32>
    %c3_i32_61 = arith.constant 3 : i32
    %85 = arith.addi %4, %c3_i32_61 : i32
    %c0_62 = arith.constant 0 : index
    %86 = arith.index_cast %85 : i32 to index
    %c0_63 = arith.constant 0 : index
    %87 = vector.load %arg3[%c0_62, %86, %c0_63] : memref<1x27x16xf32, #tpu.memory_space<vmem>>, vector<1x24x16xf32>
    %88 = vector.shape_cast %87 : vector<1x24x16xf32> to vector<24x16xf32>
    %c48_64 = arith.constant 48 : index
    %c0_65 = arith.constant 0 : index
    %89 = vector.load %arg4[%c48_64, %c0_65] : memref<64x128xf32, #tpu.memory_space<vmem>>, vector<16x128xf32>
    %cst_66 = arith.constant dense<0.000000e+00> : vector<24x128xf32>
    %90 = tpu.matmul %88, %89, %cst_66 {dimension_numbers = #tpu.dot_dimension_numbers<[1], [0], [0], [1], [0, 0, 1, 1], [], []>} : vector<24x16xf32>, vector<16x128xf32>, vector<24x128xf32> -> vector<24x128xf32>
    %91 = arith.addf %81, %90 : vector<24x128xf32>
    %c48_67 = arith.constant 48 : index
    %c0_68 = arith.constant 0 : index
    %92 = vector.load %arg5[%c48_67, %c0_68] : memref<64x128xf32, #tpu.memory_space<vmem>>, vector<16x128xf32>
    %cst_69 = arith.constant dense<0.000000e+00> : vector<24x128xf32>
    %93 = tpu.matmul %88, %92, %cst_69 {dimension_numbers = #tpu.dot_dimension_numbers<[1], [0], [0], [1], [0, 0, 1, 1], [], []>} : vector<24x16xf32>, vector<16x128xf32>, vector<24x128xf32> -> vector<24x128xf32>
    %94 = arith.addf %84, %93 : vector<24x128xf32>
    %95 = arith.mulf %91, %91 : vector<24x128xf32>
    %96 = arith.mulf %94, %94 : vector<24x128xf32>
    %97 = arith.addf %95, %96 : vector<24x128xf32>
    %98 = math.sqrt %97 : vector<24x128xf32>
    %cst_70 = arith.constant 9.99999971E-10 : f32
    %99 = vector.broadcast %cst_70 : f32 to vector<24x128xf32>
    %100 = arith.maximumf %98, %99 : vector<24x128xf32>
    %101 = math.log %100 : vector<24x128xf32>
    %cst_71 = arith.constant 3.000000e-01 : f32
    %102 = vector.broadcast %cst_71 : f32 to vector<24x128xf32>
    %103 = arith.mulf %102, %101 : vector<24x128xf32>
    %104 = math.exp %103 : vector<24x128xf32>
    %105 = math.log %52 : vector<24x128xf32>
    %cst_72 = arith.constant 3.000000e-01 : f32
    %106 = vector.broadcast %cst_72 : f32 to vector<24x128xf32>
    %107 = arith.mulf %106, %105 : vector<24x128xf32>
    %108 = math.exp %107 : vector<24x128xf32>
    %109 = arith.subf %104, %108 : vector<24x128xf32>
    %110 = arith.mulf %109, %109 : vector<24x128xf32>
    %111 = tpu.iota {dimensions = array<i32: 0>} : vector<24x128xi32>
    %112 = vector.broadcast %4 : i32 to vector<24x128xi32>
    %113 = arith.addi %112, %111 : vector<24x128xi32>
    %c22_i32 = arith.constant 22 : i32
    %114 = vector.broadcast %c22_i32 : i32 to vector<24x128xi32>
    %115 = arith.cmpi slt, %113, %114 : vector<24x128xi32>
    %cst_73 = arith.constant 0.000000e+00 : f32
    %116 = vector.broadcast %cst_73 : f32 to vector<24x128xf32>
    %117 = arith.select %115, %110, %116 : vector<24x128xi1>, vector<24x128xf32>
    %c0_74 = arith.constant 0 : index
    %c0_75 = arith.constant 0 : index
    %c0_76 = arith.constant 0 : index
    %118 = vector.load %arg6[%c0_74, %c0_75, %c0_76] : memref<1x1x128xf32, #tpu.memory_space<vmem>>, vector<1x1x128xf32>
    %119 = vector.shape_cast %118 : vector<1x1x128xf32> to vector<1x128xf32>
    %120 = vector.shape_cast %117 : vector<24x128xf32> to vector<1x24x128xf32>
    %cst_77 = arith.constant dense<0.000000e+00> : vector<1xf32>
    %121 = vector.multi_reduction <add>, %120, %cst_77 [1, 2] : vector<1x24x128xf32> to vector<1xf32>
    %122 = vector.shape_cast %121 : vector<1xf32> to vector<1x1x1xf32>
    %123 = vector.extract %122[0, 0, 0] : f32 from vector<1x1x1xf32>
    %cst_78 = arith.constant 0.00137741049 : f32
    %124 = arith.mulf %123, %cst_78 : f32
    %125 = vector.broadcast %124 : f32 to vector<1x128xf32>
    %126 = arith.addf %119, %125 : vector<1x128xf32>
    %c0_79 = arith.constant 0 : index
    %c0_80 = arith.constant 0 : index
    %c0_81 = arith.constant 0 : index
    %127 = vector.load %arg6[%c0_79, %c0_80, %c0_81] : memref<1x1x128xf32, #tpu.memory_space<vmem>>, vector<1x1x128xf32>
    %128 = vector.shape_cast %127 : vector<1x1x128xf32> to vector<1x128xf32>
    %129 = vector.shape_cast %126 : vector<1x128xf32> to vector<1x1x128xf32>
    tpu.vector_store %arg6[%c0_79, %c0_80, %c0_81], %129 {strides = array<i32>} : memref<1x1x128xf32, #tpu.memory_space<vmem>>, vector<1x1x128xf32>,
    return
  }
  func.func @transform_0(%arg0: i32, %arg1: i32) -> (i32, i32, i32) {
    %c0_i32 = arith.constant 0 : i32
    %c0_i32_0 = arith.constant 0 : i32
    %c0_i32_1 = arith.constant 0 : i32
    return %arg0, %c0_i32, %c0_i32_0 : i32, i32, i32
  }
  func.func @transform_1(%arg0: i32, %arg1: i32) -> (i32, i32, i32) {
    %c0_i32 = arith.constant 0 : i32
    %c0_i32_0 = arith.constant 0 : i32
    %c0_i32_1 = arith.constant 0 : i32
    return %arg0, %c0_i32, %c0_i32_0 : i32, i32, i32
  }
  func.func @transform_2(%arg0: i32, %arg1: i32) -> (i32, i32) {
    %c0_i32 = arith.constant 0 : i32
    %c0_i32_0 = arith.constant 0 : i32
    %c0_i32_1 = arith.constant 0 : i32
    return %c0_i32, %c0_i32_0 : i32, i32
  }
  func.func @transform_3(%arg0: i32, %arg1: i32) -> (i32, i32) {
    %c0_i32 = arith.constant 0 : i32
    %c0_i32_0 = arith.constant 0 : i32
    %c0_i32_1 = arith.constant 0 : i32
    return %c0_i32, %c0_i32_0 : i32, i32
  }
  func.func @transform_4(%arg0: i32, %arg1: i32) -> (i32, i32, i32) {
    %c0_i32 = arith.constant 0 : i32
    %c0_i32_0 = arith.constant 0 : i32
    %c0_i32_1 = arith.constant 0 : i32
    return %arg0, %c0_i32, %c0_i32_0 : i32, i32, i32
  }
}

</mosaic_0001>

<bundles_post_ra>
// kernel: multiscale_spectrogram_loss.2
= control target key start
LH: loop header
LB: loop body
LE: loop exit
PB: predicated region body
PF: predicated region fallthrough
CT: control target
= control target key end

     0   :  { %s3990_s0 = inlined_call_operand.hbm [shape: f32[2,51,8], index: 0, kind: input, shape index: {}]   ;;  %s3991_s1 = inlined_call_operand.hbm [shape: f32[2,51,8], index: 1, kind: input, shape index: {}]   ;;  %s3992_s2 = inlined_call_operand.hbm [shape: f32[32,128], index: 2, kind: input, shape index: {}]   ;;  %s3993_s3 = inlined_call_operand.hbm [shape: f32[32,128], index: 3, kind: input, shape index: {}]   ;;  %s3994_s4 = inlined_call_operand.hbm [shape: f32[2,1,128], index: 4, kind: output, shape index: {}]  }
   0x1   :  { %4001 = sst [smem:[#allocation16_spill]] %s3990_s0 }
   0x2   :  { %4002 = sst [smem:[#allocation17_spill]] %s3992_s2 }
   0x3   :  { %4003 = sst [smem:[#allocation18_spill]] %s3993_s3 }
   0x4   :  { %9 = vsyncpa [#allocation3], 0 }
   0x5   :  { %11 = vsyncpa [#allocation3 + $0x1], 0 }
   0x6   :  { %12 = vsyncpa [#allocation6], 0 }
   0x7   :  { %14 = vsyncpa [#allocation6 + $0x1], 0 }
   0x8   :  { %15 = vsyncpa [#allocation9], 0 }
   0x9   :  { %16 = vsyncpa [#allocation4], 0 }
   0xa   :  { %18 = vsyncpa [#allocation4 + $0x1], 0  ;;  %s3403_s15 = smov 0   ;;  %s3405_s16 = smov 0  }
   0xb   :  { %s3407_s17 = smov 0   ;;  %s3409_s18 = smov 0  }
   0xc   :  { %s3411_s19 = smov 0   ;;  %s3413_s20 = smov 0  }
   0xd LB: > { %s3434_s21 = sadd.s32 4294967295, %s3368_s20   ;;  %s2483_s22 = sadd.s32 4294967294, %s3368_s20   ;;  %s3368_s20 = sphi %s3413_s20, %s24_s20   ;;  %s3364_s19 = sphi %s3411_s19, %s4028_s19   ;;  %s3360_s18 = sphi %s3409_s18, %s4027_s18   ;;  %s3356_s17 = sphi %s3407_s17, %s4026_s17   ;;  %s3352_s16 = sphi %s3405_s16, %s4025_s16   ;;  %s3348_s15 = sphi %s3403_s15, %s4024_s15  }
   0xe   : > { %p56_p0 = scmp.ne.s32.totalorder %s3352_s16, %s3348_s15  ;;  %p3995_p1 = scmp.eq.s32.totalorder %s3434_s21, 0 }
   0xf   : > { %p154_p3 = scmp.eq.s32.totalorder %s2483_s22, 1  ;;  %p2484_p5 = scmp.ge.s32.totalorder %s3368_s20, 1 }
  0x10   : > { %p3443_p4 = por %p3995_p1, %p56_p0  ;;  %p161_p7 = scmp.lt.s32.totalorder %s3368_s20, 3 }
  0x11   : > { %p3448_p6 = por %p154_p3, %p56_p0  ;;  %s3370_s26 = smov [#allocation7]  }
  0x12   : > { %s4004_s23 = scalar_select %p3443_p4, 1, 0 }
  0x13   : > { %s4005_s24 = scalar_select %p3448_p6, 1, 0 }
  0x14   : > { %p3453_p8 = pnand %p2484_p5, %p161_p7  ;;  %s173_s27 = sshll.u32 %s3370_s26, 4  ;;  %s3457_s27 = int_to_ptr.vmem [resolvable:$true] %s173_s27 }
  0x15   : > { %s3371_s29 = smov [#allocation8]   ;;  %s4008_s2 = sld [smem:[#allocation17_spill]] }
  0x16   : > { %p3009_p9 = pneg %p3453_p8  ;;  %s186_s30 = sshll.u32 %s3371_s29, 4  ;;  %s3468_s30 = int_to_ptr.vmem [resolvable:$true] %s186_s30 }
  0x18   : > { %p3464_p11 = pnand %p3009_p9, %p3995_p1 }
  0x1a   : > { %p3160_p13 = pneg %p3464_p11 }
  0x1b   : > { %s3158_s7 = scalar_lea.hbm %s4008_s2, 512 }
  0x1c   : > { %p3159_p12 = scmp.ne.s32.totalorder %s4008_s2, %s3158_s7  ;;  %p3165_p5 = scmp.lt.u32.totalorder %s3158_s7, %s4008_s2 }
  0x1e   : > { %p3161_p0 = pnand %p3160_p13, %p3159_p12 }
  0x20   : > { %p3162_p3 = pneg %p3161_p0 }
  0x22   : > { %p3167_p7 = pnand %p3165_p5, %p3162_p3 }
  0x24   : > { %3170 = shalt.err (!%p3167_p7)
}
  0x25   : > { %s3171_s12 = scalar_lea.vmem %s3457_s27, 512  ;;  %p3179_p2 = scmp.lt.s32.totalorder %s3457_s27, %s3457_s27 }
  0x26   : > { %p3172_p9 = scmp.ne.s32.totalorder %s3457_s27, %s3171_s12  ;;  %p3180_p12 = scmp.lt.s32.totalorder %s3171_s12, %s3171_s12 }
  0x28   : > { %p3174_p10 = pnand %p3172_p9, %p3160_p13  ;;  %p3181_p0 = por %p3180_p12, %p3179_p2 }
  0x2a   : > { %p3175_p1 = pneg %p3174_p10 }
  0x2c   : > { %p3182_p6 = pnand %p3181_p0, %p3175_p1 }
  0x2e   : > { %3185 = shalt.err (!%p3182_p6)
}
  0x2f   : > { %s3996_s13 = smov 128   ;;  %s3373_s14 = smov 8  }
  0x30   : > { %3012 = dma.hbm_to_vmem [thread:$0]  (!%p3464_p11), %s4008_s2, 512, %s3457_s27, [#allocation6], %s3996_s13, %s3996_s13, %s3373_s14  }
  0x31   : > { %s4009_s3 = sld [smem:[#allocation18_spill]] }
  0x37   : > { %s3186_s6 = scalar_lea.hbm %s4009_s3, 512 }
  0x38   : > { %p3187_p1 = scmp.ne.s32.totalorder %s4009_s3, %s3186_s6  ;;  %p3193_p10 = scmp.lt.u32.totalorder %s3186_s6, %s4009_s3 }
  0x3a   : > { %p3189_p2 = pnand %p3187_p1, %p3160_p13 }
  0x3c   : > { %p3190_p6 = pneg %p3189_p2 }
  0x3e   : > { %p3195_p3 = pnand %p3193_p10, %p3190_p6 }
  0x40   : > { %3198 = shalt.err (!%p3195_p3)
}
  0x41   : > { %s3199_s27 = scalar_lea.vmem %s3468_s30, 512  ;;  %p3207_p12 = scmp.lt.s32.totalorder %s3468_s30, %s3468_s30 }
  0x42   : > { %p3200_p5 = scmp.ne.s32.totalorder %s3468_s30, %s3199_s27  ;;  %p3208_p0 = scmp.lt.s32.totalorder %s3199_s27, %s3199_s27 }
  0x44   : > { %p3202_p7 = pnand %p3200_p5, %p3160_p13  ;;  %p3209_p1 = por %p3208_p0, %p3207_p12 }
  0x46   : > { %p3203_p9 = pneg %p3202_p7 }
  0x48   : > { %p3210_p2 = pnand %p3209_p1, %p3203_p9 }
  0x4a   : > { %3213 = shalt.err (!%p3210_p2)
}
  0x4b   : > { %3015 = dma.hbm_to_vmem [thread:$0]  (!%p3464_p11), %s4009_s3, 512, %s3468_s30, [#allocation9], %s3996_s13, %s3996_s13, %s3373_s14  }
  0x4c   : > { %s36_s28 = sadd.s32 1, %s3364_s19  ;;  %s43_s22 = sadd.s32 1, %s3356_s17 }
  0x4d   : > { %p38_p13 = scmp.ge.s32.totalorder %s36_s28, 2  ;;  %p50_p6 = scmp.ne.s32.totalorder %s3356_s17, %s3352_s16 }
  0x4e   : > { %p51_p10 = scmp.eq.s32.totalorder %s3368_s20, 0  ;;  %p3029_p3 = scmp.lt.s32.totalorder %s3368_s20, 2 }
  0x4f   : > { %s4030_s28 = smov (%p38_p13, %s36_s28), 0  ;;  %p4010_p7 = scmp.eq.s32.totalorder %s3434_s21, 1 }
  0x50   : > { %p52_p5 = por %p51_p10, %p50_p6  ;;  %s40_s29 = ssub.s32 %s3364_s19, %s4030_s28 }
  0x51   : > { %p3538_p9 = por %p4010_p7, %p50_p6  ;;  %s200_s5 = sand.u32 1, %s3356_s17  }
  0x52   : > { %p41_p11 = scmp.eq.s32.totalorder %s40_s29, 0  ;;  %s3545_s30 = smul.u32 56, %s200_s5 }
  0x53   : > { %s4011_s26 = scalar_select %p3538_p9, 1, 0 }
  0x54   : > { %p3547_p12 = pnand %p3029_p3, %p52_p5  ;;  %s3998_s8 = smul.u32 896, %s3364_s19 }
  0x55   : > { %s3552_s7 = scalar_select %p41_p11, %s3356_s17, %s43_s22  }
  0x56   : > { %s204_s9 = scalar_lea.vmem [#allocation2], %s3545_s30  ;;  %s4013_s0 = sld [smem:[#allocation16_spill]] }
  0x57   : > { %s211_s10 = sshll.u32 %s204_s9, 4  ;;  %s3565_s29 = scalar_lea.sflag [#allocation3], %s200_s5  ;;  %s3563_s10 = int_to_ptr.vmem [resolvable:$true] %s211_s10 }
  0x58   : > { %p3216_p1 = pneg %p3547_p12 }
  0x5c   : > { %s3561_s12 = scalar_lea.hbm %s4013_s0, %s3998_s8  ;;  %s3219_s27 = scalar_lea.hbm %s4013_s0, 1792 }
  0x5d   : > { %s3214_s13 = scalar_lea.hbm %s3561_s12, 896  ;;  %p3220_p6 = scmp.lt.u32.totalorder %s3561_s12, %s4013_s0 }
  0x5e   : > { %p3215_p0 = scmp.ne.s32.totalorder %s3561_s12, %s3214_s13  ;;  %p3221_p10 = scmp.lt.u32.totalorder %s3219_s27, %s3214_s13 }
  0x5f   : > { %p3223_p5 = scmp.lt.u32.totalorder %s3214_s13, %s3561_s12 }
  0x60   : > { %p3217_p2 = pnand %p3216_p1, %p3215_p0  ;;  %p3222_p3 = por %p3221_p10, %p3220_p6 }
  0x62   : > { %p3218_p13 = pneg %p3217_p2  ;;  %p3224_p7 = por %p3223_p5, %p3222_p3 }
  0x64   : > { %p3225_p11 = pnand %p3224_p7, %p3218_p13 }
  0x66   : > { %3228 = shalt.err (!%p3225_p11)
}
  0x67   : > { %s3229_s5 = scalar_lea.vmem %s3563_s10, 896  ;;  %s3374_s22 = smov [#allocation2]  }
  0x68   : > { %p3230_p0 = scmp.ne.s32.totalorder %s3563_s10, %s3229_s5  ;;  %s3234_s9 = sshll.u32 %s3374_s22, 4  ;;  %s3235_s9 = int_to_ptr.vmem [resolvable:$false] %s3234_s9 }
  0x69   : > { %s3236_s8 = scalar_lea.vmem %s3235_s9, 1792  ;;  %p3237_p4 = scmp.lt.s32.totalorder %s3563_s10, %s3235_s9 }
  0x6a   : > { %p3232_p2 = pnand %p3230_p0, %p3216_p1  ;;  %p3238_p6 = scmp.lt.s32.totalorder %s3236_s8, %s3229_s5 }
  0x6c   : > { %p3233_p9 = pneg %p3232_p2  ;;  %p3239_p10 = por %p3238_p6, %p3237_p4 }
  0x6e   : > { %p3240_p3 = pnand %p3239_p10, %p3233_p9 }
  0x70   : > { %3243 = shalt.err (!%p3240_p3)
}
  0x71   : > { %s4014_s13 = smov 128   ;;  %s221_s27 = sand.u32 1, %s3368_s20  }
  0x72   : > { %3019 = dma.hbm_to_vmem [thread:$0]  (!%p3547_p12), %s3561_s12, 896, %s3563_s10, %s3565_s29, %s4014_s13, %s4014_s13, %s3373_s14  }
  0x73   : > { %s4015_s11 = smul.u32 896, %s3364_s19  ;;  %s225_s8 = scalar_lea.vmem [#allocation5], %s3545_s30 }
  0x74   : > { %s232_s0 = sshll.u32 %s225_s8, 4  ;;  %s3607_s2 = scalar_lea.sflag [#allocation6], %s221_s27  ;;  %s3605_s0 = int_to_ptr.vmem [resolvable:$true] %s232_s0 }
  0x75   : > { %s3602_s9 = scalar_lea.hbm %s3991_s1, %s4015_s11  ;;  %s3249_s29 = scalar_lea.hbm %s3991_s1, 1792 }
  0x76   : > { %s3244_s3 = scalar_lea.hbm %s3602_s9, 896  ;;  %p3250_p5 = scmp.lt.u32.totalorder %s3602_s9, %s3991_s1 }
  0x77   : > { %p3245_p4 = scmp.ne.s32.totalorder %s3602_s9, %s3244_s3  ;;  %p3251_p7 = scmp.lt.u32.totalorder %s3249_s29, %s3244_s3 }
  0x78   : > { %p3253_p0 = scmp.lt.u32.totalorder %s3244_s3, %s3602_s9 }
  0x79   : > { %p3247_p9 = pnand %p3245_p4, %p3216_p1  ;;  %p3252_p11 = por %p3251_p7, %p3250_p5 }
  0x7b   : > { %p3248_p13 = pneg %p3247_p9  ;;  %p3254_p2 = por %p3253_p0, %p3252_p11 }
  0x7d   : > { %p3255_p6 = pnand %p3254_p2, %p3248_p13 }
  0x7f   : > { %3258 = shalt.err (!%p3255_p6)
}
  0x80   : > { %s3259_s30 = scalar_lea.vmem %s3605_s0, 896  ;;  %s3375_s27 = smov [#allocation5]  }
  0x81   : > { %p3260_p10 = scmp.ne.s32.totalorder %s3605_s0, %s3259_s30  ;;  %s3264_s5 = sshll.u32 %s3375_s27, 4  ;;  %s3265_s5 = int_to_ptr.vmem [resolvable:$false] %s3264_s5 }
  0x82   : > { %s3266_s8 = scalar_lea.vmem %s3265_s5, 1792  ;;  %p3267_p9 = scmp.lt.s32.totalorder %s3605_s0, %s3265_s5 }
  0x83   : > { %p3262_p3 = pnand %p3260_p10, %p3216_p1  ;;  %p3268_p5 = scmp.lt.s32.totalorder %s3266_s8, %s3259_s30 }
  0x85   : > { %p3263_p4 = pneg %p3262_p3  ;;  %p3269_p7 = por %p3268_p5, %p3267_p9 }
  0x87   : > { %p3270_p11 = pnand %p3269_p7, %p3263_p4 }
  0x89   : > { %3273 = shalt.err (!%p3270_p11)
}
  0x8a   : > { %3022 = dma.hbm_to_vmem [thread:$0]  (!%p3547_p12), %s3602_s9, 896, %s3605_s0, %s3607_s2, %s4014_s13, %s4014_s13, %s3373_s14  }
  0x8b   : > { %244 = sbr.rel (%p3453_p8) target bundleno = 746 (0x2ea), region = 36  ;;  %s3639_s3 = sand.u32 (!%p3453_p8), 1, %s3352_s16  }
  0x8c   : > { %s2992_s10 = smul.u32 (!%p3453_p8), 56, %s3639_s3  ;;  %s247_s12 = scalar_lea.sflag (!%p3453_p8), [#allocation3], %s3639_s3 }
  0x8d   : > { %p4016_p1 = scmp.ne.s32.totalorder (!%p3453_p8), %s4004_s23, 0 }
  0x8e   : > { %s3643_s29 = scalar_lea.vmem (!%p3453_p8), [#allocation2], %s2992_s10 }
  0x92   : > { %3327 = dma.done.wait (%p4016_p1), %s247_s12, 896  }
  0x93   : > { %3329 = vsyncadd (%p4016_p1), %s247_s12, 4294966400  ;;  %s255_s0 = sand.u32 1, %s3434_s21   ;;  %s3650_s25 = scalar_lea.vmem [#allocation5], %s2992_s10 }
  0x94   : > { %s256_s2 = scalar_lea.sflag [#allocation6], %s255_s0 }
  0x95   : > { %3331 = dma.done.wait (%p4016_p1), %s256_s2, 896  }
  0x96   : > { %3333 = vsyncadd (%p4016_p1), %s256_s2, 4294966400  ;;  %p4017_p8 = scmp.eq.s32.totalorder %s3434_s21, 0 }
  0x98   : > { %3335 = dma.done.wait (%p4017_p8), [#allocation6], 512   ;;  %p4018_p12 = pmov %p4017_p8 }
  0x99   : > { %p4019_p13 = pmov %p4017_p8 }
  0x9a   : > { %3337 = vsyncadd (%p4018_p12), [#allocation6], 4294966784 }
  0x9b   : > { %3339 = dma.done.wait (%p4019_p13), [#allocation9], 512   ;;  %p4020_p0 = pmov %p4017_p8 }
  0x9c   : > { %vm320_vm0 = vcmask 64512   ;;  %v3664_v0 = vld [vmem:[#allocation7 + $0x8] sm:$0xff]  ;;  %v3672_v4 = vld [vmem:[#allocation7] sm:$0xff]  ;;  %v3686_v8 = vld [vmem:[#allocation7 + $0x10] sm:$0xff]  ;;  %s295_s21 = scalar_lea.vmem [#allocation10], %s3639_s3  ;;  %s2625_s14 = sshll.u32 %s3360_s18, 4 }
  0x9d   : > { %3341 = vsyncadd (%p4020_p0), [#allocation9], 4294966784  ;;  %v3666_v1 = vld [vmem:[#allocation8 + $0x8] sm:$0xff]  ;;  %2740 = vmatprep.subr.mxu0 %v3664_v0  ;;  %v3676_v5 = vld [vmem:[#allocation8] sm:$0xff]  ;;  %s2344_s13 = sshll.u32 %s295_s21, 4  ;;  %s3941_s22 = scalar_lea.hbm %s3994_s4, %s2625_s14  ;;  %s3943_s13 = int_to_ptr.vmem [resolvable:$true] %s2344_s13 }
  0x9e   : > { %v2493_v2 = vld [vmem:[%s3643_s29 + $0x1] sm:$0xff]  ;;  %2762 = vmatprep.subr.mxu1 %v3666_v1  ;;  %v2494_v3 = vld [vmem:[%s3643_s29 + $0x9] sm:$0xff]  ;;  %2741 = vmatpush3.msra.mxu0 %v3664_v0  ;;  %v2495_v6 = vld [vmem:[%s3643_s29 + $0x11] sm:$0xff]  ;;  %s2332_s30 = scalar_lea.sflag [#allocation4], %s3639_s3  ;;  %s3274_s27 = scalar_lea.vmem %s3943_s13, 16 }
  0x9f   : > { %2742 = vmatprep.mubr.msk.f32.mxu0 %vm320_vm0, %v2493_v2  ;;  %2763 = vmatpush3.msra.mxu1 %v3666_v1  ;;  %v2496_v7 = vld [vmem:[%s3643_s29 + $0x19] sm:$0xff]  ;;  %v2497_v9 = vld [vmem:[%s3643_s29 + $0x21] sm:$0xff]  ;;  %v2498_v11 = vld [vmem:[%s3643_s29 + $0x29] sm:$0xff]  ;;  %p3275_p2 = scmp.ne.s32.totalorder %s3943_s13, %s3274_s27  ;;  %p4021_p6 = scmp.ne.s32.totalorder %s4011_s26, 0 }
  0xa0   : > { %2764 = vmatprep.mubr.msk.f32.mxu1 %vm320_vm0, %v2493_v2  ;;  %2743 = vmatmul.mubr.msk.f32.vlgmr.msra.gmra.mrb[0].mxu0 %vm320_vm0, %v2494_v3  ;;  %v3693_v10 = vld [vmem:[#allocation8 + $0x10] sm:$0xff]  ;;  %v303_v12 = vld [vmem:[%s3643_s29] sm:$0xff]  ;;  %v304_v13 = vld [vmem:[%s3643_s29 + $0x8] sm:$0xff]  ;;  %s3377_s18 = smov [#allocation10]  }
  0xa1   : > { %2751 = vmatprep.subr.mxu0 %v3672_v4  ;;  %2765 = vmatmul.mubr.msk.f32.vlgmr.msra.gmra.mrb[0].mxu1 %vm320_vm0, %v2494_v3  ;;  %v305_v14 = vld [vmem:[%s3643_s29 + $0x10] sm:$0xff]  ;;  %v3710_v15 = vld [vmem:[#allocation7 + $0x18] sm:$0xff]  ;;  %v308_v19 = vld [vmem:[%s3643_s29 + $0x28] sm:$0xff]  ;;  %p3276_p10 = pnand %p3275_p2, %p4021_p6  ;;  %s3278_s5 = sshll.u32 %s3377_s18, 4  ;;  %s3279_s5 = int_to_ptr.vmem [resolvable:$false] %s3278_s5 }
  0xa2   : > { %2773 = vmatprep.subr.mxu1 %v3676_v5  ;;  %2752 = vmatpush3.msra.mxu0 %v3672_v4  ;;  %v306_v16 = vld [vmem:[%s3643_s29 + $0x18] sm:$0xff]  ;;  %v307_v18 = vld [vmem:[%s3643_s29 + $0x20] sm:$0xff]  ;;  %v2524_v21 = vld [vmem:[%s3643_s29 + $0xa] sm:$0xff]  ;;  %s3280_s8 = scalar_lea.vmem %s3279_s5, 32  ;;  %p3281_p4 = scmp.lt.s32.totalorder %s3943_s13, %s3279_s5 }
  0xa3   : > { %2774 = vmatpush3.msra.mxu1 %v3676_v5  ;;  %2745 = vmatprep.mubr.msk.f32.mxu0 %vm320_vm0, %v2495_v6  ;;  %v3715_v17 = vld [vmem:[#allocation8 + $0x18] sm:$0xff]  ;;  %v2528_v25 = vld [vmem:[%s3643_s29 + $0x2a] sm:$0xff]  ;;  %p3277_p3 = pneg %p3276_p10  ;;  %p3282_p9 = scmp.lt.s32.totalorder %s3280_s8, %s3274_s27 }
  0xa4   : > { %2767 = vmatprep.mubr.msk.f32.mxu1 %vm320_vm0, %v2495_v6  ;;  %2746 = vmatmul.mubr.msk.f32.gmra.mrb[2].mxu0 %vm320_vm0, %v2496_v7  ;;  %v2523_v20 = vld [vmem:[%s3643_s29 + $0x2] sm:$0xff]  ;;  %v2525_v22 = vld [vmem:[%s3643_s29 + $0x12] sm:$0xff]  ;;  %v2526_v23 = vld [vmem:[%s3643_s29 + $0x1a] sm:$0xff] }
  0xa5   : > { %2784 = vmatprep.subr.mxu0 %v3686_v8  ;;  %2768 = vmatmul.mubr.msk.f32.gmra.mrb[2].mxu1 %vm320_vm0, %v2496_v7  ;;  %v2527_v24 = vld [vmem:[%s3643_s29 + $0x22] sm:$0xff]  ;;  %v2542_v27 = vld [vmem:[%s3643_s29 + $0xb] sm:$0xff]  ;;  %v2543_v28 = vld [vmem:[%s3643_s29 + $0x13] sm:$0xff]  ;;  %p3283_p5 = por %p3282_p9, %p3281_p4 }
  0xa6   : > { %2748 = vmatprep.mubr.msk.f32.mxu0 %vm320_vm0, %v2497_v9  ;;  %2770 = vmatprep.mubr.msk.f32.mxu1 %vm320_vm0, %v2497_v9  ;;  %v2541_v26 = vld [vmem:[%s3643_s29 + $0x3] sm:$0xff]  ;;  %v2544_v29 = vld [vmem:[%s3643_s29 + $0x1b] sm:$0xff]  ;;  %v2546_v31 = vld [vmem:[%s3643_s29 + $0x2b] sm:$0xff] }
  0xa7   : > { %2795 = vmatprep.subr.mxu1 %v3693_v10  ;;  %v2545_v30 = vld [vmem:[%s3643_s29 + $0x23] sm:$0xff]  ;;  %v2559_v32 = vld [vmem:[%s3650_s25 + $0x1] sm:$0xff]  ;;  %v2560_v33 = vld [vmem:[%s3650_s25 + $0x9] sm:$0xff]  ;;  %p3284_p7 = pnand %p3283_p5, %p3277_p3 }
  0xa8   : > { %2749 = vmatmul.mubr.msk.f32.gmra.mrb[4].mxu0 %vm320_vm0, %v2498_v11  ;;  %v2561_v34 = vld [vmem:[%s3650_s25 + $0x11] sm:$0xff]  ;;  %v2562_v35 = vld [vmem:[%s3650_s25 + $0x19] sm:$0xff]  ;;  %v2563_v36 = vld [vmem:[%s3650_s25 + $0x21] sm:$0xff] }
  0xa9   : > { %2771 = vmatmul.mubr.msk.f32.gmra.mrb[4].mxu1 %vm320_vm0, %v2498_v11  ;;  %2753 = vmatprep.mubr.msk.f32.mxu0 %vm320_vm0, %v303_v12  ;;  %v2564_v37 = vld [vmem:[%s3650_s25 + $0x29] sm:$0xff]  ;;  %v1265_v38 = vld [vmem:[%s3650_s25] sm:$0xff]  ;;  %v1268_v41 = vld [vmem:[%s3650_s25 + $0x18] sm:$0xff] }
  0xaa   : > { %2775 = vmatprep.mubr.msk.f32.mxu1 %vm320_vm0, %v303_v12  ;;  %v1266_v39 = vld [vmem:[%s3650_s25 + $0x8] sm:$0xff]  ;;  %v1267_v40 = vld [vmem:[%s3650_s25 + $0x10] sm:$0xff]  ;;  %v1269_v42 = vld [vmem:[%s3650_s25 + $0x20] sm:$0xff] }
  0xab   : > { %v1270_v43 = vld [vmem:[%s3650_s25 + $0x28] sm:$0xff]  ;;  %v2591_v46 = vld [vmem:[%s3650_s25 + $0x12] sm:$0xff]  ;;  %v2592_v47 = vld [vmem:[%s3650_s25 + $0x1a] sm:$0xff] }
  0xac   : > { %2754 = vmatmul.mubr.msk.f32.vlgmr.msra.gmra.mrb[0].mxu0 %vm320_vm0, %v304_v13  ;;  %v2589_v44 = vld [vmem:[%s3650_s25 + $0x2] sm:$0xff]  ;;  %v2590_v45 = vld [vmem:[%s3650_s25 + $0xa] sm:$0xff]  ;;  %v2609_v52 = vld [vmem:[%s3650_s25 + $0x13] sm:$0xff] }
  0xad   : > { %2776 = vmatmul.mubr.msk.f32.vlgmr.msra.gmra.mrb[0].mxu1 %vm320_vm0, %v304_v13  ;;  %2785 = vmatpush3.msra.mxu0 %v3686_v8  ;;  %v2593_v48 = vld [vmem:[%s3650_s25 + $0x22] sm:$0xff]  ;;  %v2594_v49 = vld [vmem:[%s3650_s25 + $0x2a] sm:$0xff] }
  0xae   : > { %2796 = vmatpush3.msra.mxu1 %v3693_v10  ;;  %2756 = vmatprep.mubr.msk.f32.mxu0 %vm320_vm0, %v305_v14  ;;  %v2607_v50 = vld [vmem:[%s3650_s25 + $0x3] sm:$0xff]  ;;  %v2608_v51 = vld [vmem:[%s3650_s25 + $0xb] sm:$0xff]  ;;  %v2610_v53 = vld [vmem:[%s3650_s25 + $0x1b] sm:$0xff] }
  0xaf   : > { %2778 = vmatprep.mubr.msk.f32.mxu1 %vm320_vm0, %v305_v14  ;;  %2806 = vmatprep.subr.mxu0 %v3710_v15  ;;  %v2611_v54 = vld [vmem:[%s3650_s25 + $0x23] sm:$0xff]  ;;  %v2612_v55 = vld [vmem:[%s3650_s25 + $0x2b] sm:$0xff] }
  0xb0   : > { %2757 = vmatmul.mubr.msk.f32.gmra.mrb[2].mxu0 %vm320_vm0, %v306_v16  ;;  %2817 = vmatprep.subr.mxu1 %v3715_v17 }
  0xb1   : > { %2779 = vmatmul.mubr.msk.f32.gmra.mrb[2].mxu1 %vm320_vm0, %v306_v16  ;;  %2759 = vmatprep.mubr.msk.f32.mxu0 %vm320_vm0, %v307_v18 }
  0xb2   : > { %2781 = vmatprep.mubr.msk.f32.mxu1 %vm320_vm0, %v307_v18 }
  0xb4   : > { %2760 = vmatmul.mubr.msk.f32.gmra.mrb[4].mxu0 %vm320_vm0, %v308_v19 }
  0xb5   : > { %2782 = vmatmul.mubr.msk.f32.gmra.mrb[4].mxu1 %vm320_vm0, %v308_v19  ;;  %2786 = vmatprep.mubr.msk.f32.mxu0 %vm320_vm0, %v2523_v20 }
  0xb6   : > { %2797 = vmatprep.mubr.msk.f32.mxu1 %vm320_vm0, %v2523_v20 }
  0xb8   : > { %2787 = vmatmul.mubr.msk.f32.vlgmr.msra.gmra.mrb[0].mxu0 %vm320_vm0, %v2524_v21 }
  0xb9   : > { %2798 = vmatmul.mubr.msk.f32.vlgmr.msra.gmra.mrb[0].mxu1 %vm320_vm0, %v2524_v21  ;;  %2807 = vmatpush3.msra.mxu0 %v3710_v15 }
  0xba   : > { %2818 = vmatpush3.msra.mxu1 %v3715_v17  ;;  %2789 = vmatprep.mubr.msk.f32.mxu0 %vm320_vm0, %v2525_v22 }
  0xbb   : > { %2800 = vmatprep.mubr.msk.f32.mxu1 %vm320_vm0, %v2525_v22  ;;  %2828 = vmatprep.subr.mxu0 %v3664_v0 }
  0xbc   : > { %2790 = vmatmul.mubr.msk.f32.gmra.mrb[2].mxu0 %vm320_vm0, %v2526_v23  ;;  %2850 = vmatprep.subr.mxu1 %v3666_v1 }
  0xbd   : > { %2801 = vmatmul.mubr.msk.f32.gmra.mrb[2].mxu1 %vm320_vm0, %v2526_v23  ;;  %2792 = vmatprep.mubr.msk.f32.mxu0 %vm320_vm0, %v2527_v24 }
  0xbe   : > { %2803 = vmatprep.mubr.msk.f32.mxu1 %vm320_vm0, %v2527_v24 }
  0xc0   : > { %2793 = vmatmul.mubr.msk.f32.gmra.mrb[4].mxu0 %vm320_vm0, %v2528_v25 }
  0xc1   : > { %2804 = vmatmul.mubr.msk.f32.gmra.mrb[4].mxu1 %vm320_vm0, %v2528_v25  ;;  %2808 = vmatprep.mubr.msk.f32.mxu0 %vm320_vm0, %v2541_v26 }
  0xc2   : > { %2819 = vmatprep.mubr.msk.f32.mxu1 %vm320_vm0, %v2541_v26 }
  0xc4   : > { %2809 = vmatmul.mubr.msk.f32.vlgmr.msra.gmra.mrb[0].mxu0 %vm320_vm0, %v2542_v27 }
  0xc5   : > { %2820 = vmatmul.mubr.msk.f32.vlgmr.msra.gmra.mrb[0].mxu1 %vm320_vm0, %v2542_v27  ;;  %2829 = vmatpush3.msra.mxu0 %v3664_v0 }
  0xc6   : > { %2851 = vmatpush3.msra.mxu1 %v3666_v1  ;;  %2811 = vmatprep.mubr.msk.f32.mxu0 %vm320_vm0, %v2543_v28 }
  0xc7   : > { %2822 = vmatprep.mubr.msk.f32.mxu1 %vm320_vm0, %v2543_v28  ;;  %2839 = vmatprep.subr.mxu0 %v3672_v4 }
  0xc8   : > { %2812 = vmatmul.mubr.msk.f32.gmra.mrb[2].mxu0 %vm320_vm0, %v2544_v29  ;;  %2861 = vmatprep.subr.mxu1 %v3676_v5 }
  0xc9   : > { %2823 = vmatmul.mubr.msk.f32.gmra.mrb[2].mxu1 %vm320_vm0, %v2544_v29  ;;  %2814 = vmatprep.mubr.msk.f32.mxu0 %vm320_vm0, %v2545_v30 }
  0xca   : > { %2825 = vmatprep.mubr.msk.f32.mxu1 %vm320_vm0, %v2545_v30 }
  0xcc   : > { %2815 = vmatmul.mubr.msk.f32.gmra.mrb[4].mxu0 %vm320_vm0, %v2546_v31 }
  0xcd   : > { %2826 = vmatmul.mubr.msk.f32.gmra.mrb[4].mxu1 %vm320_vm0, %v2546_v31  ;;  %2830 = vmatprep.mubr.msk.f32.mxu0 %vm320_vm0, %v2559_v32 }
  0xce   : > { %2852 = vmatprep.mubr.msk.f32.mxu1 %vm320_vm0, %v2559_v32 }
  0xd0   : > { %2831 = vmatmul.mubr.msk.f32.vlgmr.msra.gmra.mrb[6].mxu0 %vm320_vm0, %v2560_v33 }
  0xd1   : > { %2853 = vmatmul.mubr.msk.f32.vlgmr.msra.gmra.mrb[6].mxu1 %vm320_vm0, %v2560_v33  ;;  %2840 = vmatpush3.msra.mxu0 %v3672_v4 }
  0xd2   : > { %2862 = vmatpush3.msra.mxu1 %v3676_v5  ;;  %2833 = vmatprep.mubr.msk.f32.mxu0 %vm320_vm0, %v2561_v34 }
  0xd3   : > { %2855 = vmatprep.mubr.msk.f32.mxu1 %vm320_vm0, %v2561_v34  ;;  %2872 = vmatprep.subr.mxu0 %v3686_v8 }
  0xd4   : > { %2834 = vmatmul.mubr.msk.f32.gmra.mrb[8].mxu0 %vm320_vm0, %v2562_v35  ;;  %2883 = vmatprep.subr.mxu1 %v3693_v10 }
  0xd5   : > { %2856 = vmatmul.mubr.msk.f32.gmra.mrb[8].mxu1 %vm320_vm0, %v2562_v35  ;;  %2836 = vmatprep.mubr.msk.f32.mxu0 %vm320_vm0, %v2563_v36 }
  0xd6   : > { %2858 = vmatprep.mubr.msk.f32.mxu1 %vm320_vm0, %v2563_v36 }
  0xd8   : > { %2837 = vmatmul.mubr.msk.f32.gmra.mrb[10].mxu0 %vm320_vm0, %v2564_v37 }
  0xd9   : > { %2859 = vmatmul.mubr.msk.f32.gmra.mrb[10].mxu1 %vm320_vm0, %v2564_v37  ;;  %2841 = vmatprep.mubr.msk.f32.mxu0 %vm320_vm0, %v1265_v38 }
  0xda   : > { %2863 = vmatprep.mubr.msk.f32.mxu1 %vm320_vm0, %v1265_v38 }
  0xdc   : > { %2842 = vmatmul.mubr.msk.f32.vlgmr.msra.gmra.mrb[6].mxu0 %vm320_vm0, %v1266_v39 }
  0xdd   : > { %2864 = vmatmul.mubr.msk.f32.vlgmr.msra.gmra.mrb[6].mxu1 %vm320_vm0, %v1266_v39  ;;  %2873 = vmatpush3.msra.mxu0 %v3686_v8 }
  0xde   : > { %2884 = vmatpush3.msra.mxu1 %v3693_v10  ;;  %2844 = vmatprep.mubr.msk.f32.mxu0 %vm320_vm0, %v1267_v40 }
  0xdf   : > { %2866 = vmatprep.mubr.msk.f32.mxu1 %vm320_vm0, %v1267_v40  ;;  %2894 = vmatprep.subr.mxu0 %v3710_v15 }
  0xe0   : > { %2845 = vmatmul.mubr.msk.f32.gmra.mrb[8].mxu0 %vm320_vm0, %v1268_v41  ;;  %2905 = vmatprep.subr.mxu1 %v3715_v17 }
  0xe1   : > { %2867 = vmatmul.mubr.msk.f32.gmra.mrb[8].mxu1 %vm320_vm0, %v1268_v41  ;;  %2847 = vmatprep.mubr.msk.f32.mxu0 %vm320_vm0, %v1269_v42 }
  0xe2   : > { %2869 = vmatprep.mubr.msk.f32.mxu1 %vm320_vm0, %v1269_v42 }
  0xe4   : > { %2848 = vmatmul.mubr.msk.f32.gmra.mrb[10].mxu0 %vm320_vm0, %v1270_v43 }
  0xe5   : > { %2870 = vmatmul.mubr.msk.f32.gmra.mrb[10].mxu1 %vm320_vm0, %v1270_v43  ;;  %2874 = vmatprep.mubr.msk.f32.mxu0 %vm320_vm0, %v2589_v44 }
  0xe6   : > { %2885 = vmatprep.mubr.msk.f32.mxu1 %vm320_vm0, %v2589_v44 }
  0xe8   : > { %2875 = vmatmul.mubr.msk.f32.vlgmr.msra.gmra.mrb[6].mxu0 %vm320_vm0, %v2590_v45 }
  0xe9   : > { %2886 = vmatmul.mubr.msk.f32.vlgmr.msra.gmra.mrb[6].mxu1 %vm320_vm0, %v2590_v45  ;;  %2895 = vmatpush3.msra.mxu0 %v3710_v15 }
  0xea   : > { %2906 = vmatpush3.msra.mxu1 %v3715_v17  ;;  %2877 = vmatprep.mubr.msk.f32.mxu0 %vm320_vm0, %v2591_v46 }
  0xeb   : > { %2888 = vmatprep.mubr.msk.f32.mxu1 %vm320_vm0, %v2591_v46 }
  0xec   : > { %2878 = vmatmul.mubr.msk.f32.gmra.mrb[8].mxu0 %vm320_vm0, %v2592_v47 }
  0xed   : > { %2889 = vmatmul.mubr.msk.f32.gmra.mrb[8].mxu1 %vm320_vm0, %v2592_v47  ;;  %2880 = vmatprep.mubr.msk.f32.mxu0 %vm320_vm0, %v2593_v48 }
  0xee   : > { %2891 = vmatprep.mubr.msk.f32.mxu1 %vm320_vm0, %v2593_v48 }
  0xf0   : > { %2881 = vmatmul.mubr.msk.f32.gmra.mrb[10].mxu0 %vm320_vm0, %v2594_v49 }
  0xf1   : > { %2892 = vmatmul.mubr.msk.f32.gmra.mrb[10].mxu1 %vm320_vm0, %v2594_v49  ;;  %2896 = vmatprep.mubr.msk.f32.mxu0 %vm320_vm0, %v2607_v50 }
  0xf2   : > { %2907 = vmatprep.mubr.msk.f32.mxu1 %vm320_vm0, %v2607_v50 }
  0xf4   : > { %2897 = vmatmul.mubr.msk.f32.vlgmr.msra.gmra.mrb[6].mxu0 %vm320_vm0, %v2608_v51 }
  0xf5   : > { %2908 = vmatmul.mubr.msk.f32.vlgmr.msra.gmra.mrb[6].mxu1 %vm320_vm0, %v2608_v51  ;;  %2899 = vmatprep.mubr.msk.f32.mxu0 %vm320_vm0, %v2609_v52 }
  0xf6   : > { %2910 = vmatprep.mubr.msk.f32.mxu1 %vm320_vm0, %v2609_v52 }
  0xf8   : > { %2900 = vmatmul.mubr.msk.f32.gmra.mrb[8].mxu0 %vm320_vm0, %v2610_v53 }
  0xf9   : > { %2911 = vmatmul.mubr.msk.f32.gmra.mrb[8].mxu1 %vm320_vm0, %v2610_v53  ;;  %2902 = vmatprep.mubr.msk.f32.mxu0 %vm320_vm0, %v2611_v54 }
  0xfa   : > { %2913 = vmatprep.mubr.msk.f32.mxu1 %vm320_vm0, %v2611_v54 }
  0xfc   : > { %2903 = vmatmul.mubr.msk.f32.gmra.mrb[10].mxu0 %vm320_vm0, %v2612_v55 }
  0xfd   : > { %2914 = vmatmul.mubr.msk.f32.gmra.mrb[10].mxu1 %vm320_vm0, %v2612_v55 }
 0x197   : > { %v2810_v56 = vpop.f32.mrb[0].mxu0 }
 0x198   : > { %v1199_v57 = vmul.f32 %v2810_v56, %v2810_v56  ;;  %v2821_v58 = vpop.f32.mrb[0].mxu1  ;;  %v1061_v59 = vpop.f32.mrb[1].mxu0 }
 0x199   : > { %v1205_v60 = vmul.f32 %v2821_v58, %v2821_v58  ;;  %v1198_v61 = vmul.f32 %v1061_v59, %v1061_v59  ;;  %v1163_v62 = vpop.f32.mrb[1].mxu1 }
 0x19a   : > { %v1204_v63 = vmul.f32 %v1163_v62, %v1163_v62 }
 0x19b   : > { %v1211_v0 = vadd.f32 %v1205_v60, %v1199_v57  ;;  %v2813_v1 = vpop.f32.mrb[2].mxu0 }
 0x19c   : > { %v1210_v2 = vadd.f32 %v1204_v63, %v1198_v61  ;;  %v2824_v3 = vpop.f32.mrb[2].mxu1  ;;  %v1071_v4 = vpop.f32.mrb[3].mxu0  ;;  %v1201_v5 = vmul.f32 %v2813_v1, %v2813_v1 }
 0x19d   : > { %v1173_v6 = vpop.f32.mrb[3].mxu1  ;;  %v1207_v7 = vmul.f32 %v2824_v3, %v2824_v3  ;;  %v1200_v8 = vmul.f32 %v1071_v4, %v1071_v4  ;;  %3086 = vrsqrt.f32 %v1211_v0  ;;  %vm1225_vm1 = vcmp.eq.f32.partialorder %v1211_v0, inf }
 0x19e   : > { %v1206_v9 = vmul.f32 %v1173_v6, %v1173_v6  ;;  %3088 = vrsqrt.f32 %v1210_v2  ;;  %v1228_v27 = vand.u32 2147483648, %v1211_v0  ;;  %vm1227_vm2 = vcmp.eq.f32.partialorder %v1211_v0, 0.0 }
 0x19f   : > { %v2816_v10 = vpop.f32.mrb[4].mxu0  ;;  %v3856_v14 = vadd.f32 %v1207_v7, %v1201_v5  ;;  %vm1218_vm3 = vcmp.eq.f32.partialorder %v1210_v2, inf  ;;  %v1221_v31 = vand.u32 2147483648, %v1210_v2  ;;  %vm1220_vm4 = vcmp.eq.f32.partialorder %v1210_v2, 0.0 }
 0x1a0   : > { %v1203_v11 = vmul.f32 %v2816_v10, %v2816_v10  ;;  %v2827_v12 = vpop.f32.mrb[4].mxu1  ;;  %v1081_v13 = vpop.f32.mrb[5].mxu0  ;;  %v3858_v15 = vadd.f32 %v1206_v9, %v1200_v8 }
 0x1a1   : > { %v1209_v16 = vmul.f32 %v2827_v12, %v2827_v12  ;;  %v1202_v17 = vmul.f32 %v1081_v13, %v1081_v13  ;;  %v1183_v18 = vpop.f32.mrb[5].mxu1  ;;  %3090 = vrsqrt.f32 %v3856_v14  ;;  %vm1239_vm5 = vcmp.eq.f32.partialorder %v3856_v14, inf }
 0x1a2   : > { %v1208_v19 = vmul.f32 %v1183_v18, %v1183_v18  ;;  %3092 = vrsqrt.f32 %v3858_v15  ;;  %v1242_v46 = vand.u32 2147483648, %v3856_v14  ;;  %vm1241_vm6 = vcmp.eq.f32.partialorder %v3856_v14, 0.0 }
 0x1a3   : > { %v3860_v20 = vadd.f32 %v1209_v16, %v1203_v11  ;;  %vm1232_vm7 = vcmp.eq.f32.partialorder %v3858_v15, inf  ;;  %v1235_v57 = vand.u32 2147483648, %v3858_v15  ;;  %vm1234_vm10 = vcmp.eq.f32.partialorder %v3858_v15, 0.0 }
 0x1a4   : > { %v3862_v21 = vadd.f32 %v1208_v19, %v1202_v17 }
 0x1a5   : > { %3094 = vrsqrt.f32 %v3860_v20  ;;  %vm1253_vm8 = vcmp.eq.f32.partialorder %v3860_v20, inf  ;;  %v1256_v13 = vand.u32 2147483648, %v3860_v20  ;;  %vm1255_vm11 = vcmp.eq.f32.partialorder %v3860_v20, 0.0 }
 0x1a6   : > { %3096 = vrsqrt.f32 %v3862_v21  ;;  %vm1246_vm9 = vcmp.eq.f32.partialorder %v3862_v21, inf  ;;  %v1249_v17 = vand.u32 2147483648, %v3862_v21  ;;  %vm1248_vm12 = vcmp.eq.f32.partialorder %v3862_v21, 0.0 }
 0x1a7   : > { %v3087_v22 = vpop.eup %3086 }
 0x1a8   : > { %v1224_v23 = vmul.f32 %v3087_v22, %v1211_v0  ;;  %v3089_v24 = vpop.eup %3088 }
 0x1a9   : > { %v1217_v26 = vmul.f32 %v3089_v24, %v1210_v2 }
 0x1aa   : > { %v1226_v25 = vsel %vm1225_vm1, %v1211_v0, %v1224_v23 }
 0x1ab   : > { %v3091_v28 = vpop.eup %3090  ;;  %v1229_v29 = vsel %vm1227_vm2, %v1228_v27, %v1226_v25  ;;  %v1219_v30 = vsel %vm1218_vm3, %v1210_v2, %v1217_v26 }
 0x1ac   : > { %v1238_v32 = vmul.f32 %v3091_v28, %v3856_v14  ;;  %v1259_v34 = vmax.f32 %v1229_v29, 1e-09  ;;  %v3093_v38 = vpop.eup %3092  ;;  %v1222_v39 = vsel %vm1220_vm4, %v1221_v31, %v1219_v30 }
 0x1ad   : > { %v1258_v50 = vmax.f32 %v1222_v39, 1e-09  ;;  %v1231_v51 = vmul.f32 %v3093_v38, %v3858_v15 }
 0x1ae   : > { %v1240_v45 = vsel %vm1239_vm5, %v3856_v14, %v1238_v32  ;;  %3098 = vlog2.f32 %v1259_v34 }
 0x1af   : > { %v3095_v44 = vpop.eup %3094  ;;  %v1243_v59 = vsel %vm1241_vm6, %v1242_v46, %v1240_v45  ;;  %v1233_v1 = vsel %vm1232_vm7, %v3858_v15, %v1231_v51 }
 0x1b0   : > { %v3097_v49 = vpop.eup %3096  ;;  %v1252_v58 = vmul.f32 %v3095_v44, %v3860_v20  ;;  %v1261_v12 = vmax.f32 %v1243_v59, 1e-09  ;;  %v1236_v16 = vsel %vm1234_vm10, %v1235_v57, %v1233_v1 }
 0x1b1   : > { %v1245_v60 = vmul.f32 %v3097_v49, %v3862_v21  ;;  %v1260_v25 = vmax.f32 %v1236_v16, 1e-09 }
 0x1b2   : > { %v1254_v10 = vsel %vm1253_vm8, %v3860_v20, %v1252_v58 }
 0x1b3   : > { %v1247_v14 = vsel %vm1246_vm9, %v3862_v21, %v1245_v60  ;;  %v1257_v15 = vsel %vm1255_vm11, %v1256_v13, %v1254_v10 }
 0x1b4   : > { %v1250_v23 = vsel %vm1248_vm12, %v1249_v17, %v1247_v14  ;;  %v1263_v27 = vmax.f32 %v1257_v15, 1e-09 }
 0x1b5   : > { %v1262_v29 = vmax.f32 %v1250_v23, 1e-09 }
 0x1b8   : > { %v3099_v22 = vpop.eup %3098 }
 0x1b9   : > { %v2247_v39 = vmul.f32 0.6931472, %v3099_v22 }
 0x1bb   : > { %v2257_v51 = vmul.f32 0.3, %v2247_v39 }
 0x1c7   : > { %v2898_v33 = vpop.f32.mrb[6].mxu0 }
 0x1c8   : > { %v2149_v35 = vmul.f32 %v2898_v33, %v2898_v33  ;;  %v2909_v36 = vpop.f32.mrb[6].mxu1  ;;  %v2012_v37 = vpop.f32.mrb[7].mxu0 }
 0x1c9   : > { %v2155_v40 = vmul.f32 %v2909_v36, %v2909_v36  ;;  %v2148_v41 = vmul.f32 %v2012_v37, %v2012_v37  ;;  %v2113_v42 = vpop.f32.mrb[7].mxu1 }
 0x1ca   : > { %v2154_v43 = vmul.f32 %v2113_v42, %v2113_v42 }
 0x1cb   : > { %v3872_v47 = vadd.f32 %v2155_v40, %v2149_v35  ;;  %v2901_v48 = vpop.f32.mrb[8].mxu0 }
 0x1cc   : > { %v3875_v52 = vadd.f32 %v2154_v43, %v2148_v41  ;;  %v2912_v53 = vpop.f32.mrb[8].mxu1  ;;  %v2022_v54 = vpop.f32.mrb[9].mxu0  ;;  %v2151_v55 = vmul.f32 %v2901_v48, %v2901_v48 }
 0x1cd   : > { %3100 = vrsqrt.f32 %v3872_v47  ;;  %v2123_v56 = vpop.f32.mrb[9].mxu1  ;;  %v2157_v61 = vmul.f32 %v2912_v53, %v2912_v53  ;;  %v2150_v62 = vmul.f32 %v2022_v54, %v2022_v54  ;;  %vm2175_vm13 = vcmp.eq.f32.partialorder %v3872_v47, inf }
 0x1ce   : > { %3102 = vrsqrt.f32 %v3875_v52  ;;  %v2156_v63 = vmul.f32 %v2123_v56, %v2123_v56  ;;  %v2178_v21 = vand.u32 2147483648, %v3872_v47  ;;  %vm2177_vm14 = vcmp.eq.f32.partialorder %v3872_v47, 0.0 }
 0x1cf   : > { %v2904_v0 = vpop.f32.mrb[10].mxu0  ;;  %3104 = vlog2.f32 %v1258_v50  ;;  %v3886_v5 = vadd.f32 %v2157_v61, %v2151_v55  ;;  %vm2168_vm15 = vcmp.eq.f32.partialorder %v3875_v52, inf  ;;  %v2171_v32 = vand.u32 2147483648, %v3875_v52 }
 0x1d0   : > { %v2153_v2 = vmul.f32 %v2904_v0, %v2904_v0  ;;  %v2915_v3 = vpop.f32.mrb[10].mxu1  ;;  %v2032_v4 = vpop.f32.mrb[11].mxu0  ;;  %v3888_v6 = vadd.f32 %v2156_v63, %v2150_v62  ;;  %vm2170_vm0 = vcmp.eq.f32.partialorder %v3875_v52, 0.0 }
 0x1d1   : > { %v2159_v7 = vmul.f32 %v2915_v3, %v2915_v3  ;;  %v2152_v8 = vmul.f32 %v2032_v4, %v2032_v4  ;;  %v2133_v9 = vpop.f32.mrb[11].mxu1  ;;  %3106 = vrsqrt.f32 %v3886_v5  ;;  %vm2189_vm1 = vcmp.eq.f32.partialorder %v3886_v5, inf }
 0x1d2   : > { %v2158_v11 = vmul.f32 %v2133_v9, %v2133_v9  ;;  %3108 = vrsqrt.f32 %v3888_v6  ;;  %v2192_v43 = vand.u32 2147483648, %v3886_v5  ;;  %vm2191_vm2 = vcmp.eq.f32.partialorder %v3886_v5, 0.0 }
 0x1d3   : > { %v3900_v18 = vadd.f32 %v2159_v7, %v2153_v2  ;;  %3110 = vlog2.f32 %v1261_v12  ;;  %vm2182_vm3 = vcmp.eq.f32.partialorder %v3888_v6, inf  ;;  %vm2184_vm4 = vcmp.eq.f32.partialorder %v3888_v6, 0.0 }
 0x1d4   : > { %v3902_v19 = vadd.f32 %v2158_v11, %v2152_v8  ;;  %v2264_v11 = vmul.f32 1.442695, %v2257_v51 }
 0x1d5   : > { %3112 = vrsqrt.f32 %v3900_v18  ;;  %vm2203_vm5 = vcmp.eq.f32.partialorder %v3900_v18, inf  ;;  %vm2205_vm6 = vcmp.eq.f32.partialorder %v3900_v18, 0.0  ;;  %v2206_v57 = vand.u32 2147483648, %v3900_v18 }
 0x1d6   : > { %3114 = vrsqrt.f32 %v3902_v19  ;;  %vm2196_vm7 = vcmp.eq.f32.partialorder %v3902_v19, inf  ;;  %v2199_v60 = vand.u32 2147483648, %v3902_v19  ;;  %vm2198_vm8 = vcmp.eq.f32.partialorder %v3902_v19, 0.0 }
 0x1d7   : > { %v3101_v24 = vpop.eup %3100  ;;  %3116 = vlog2.f32 %v1260_v25 }
 0x1d8   : > { %v3103_v26 = vpop.eup %3102  ;;  %v2174_v20 = vmul.f32 %v3101_v24, %v3872_v47  ;;  %3118 = vlog2.f32 %v1263_v27 }
 0x1d9   : > { %v2167_v28 = vmul.f32 %v3103_v26, %v3875_v52  ;;  %v3105_v30 = vpop.eup %3104  ;;  %3120 = vlog2.f32 %v1262_v29 }
 0x1da   : > { %v2176_v31 = vsel %vm2175_vm13, %v3872_v47, %v2174_v20  ;;  %v2245_v42 = vmul.f32 0.6931472, %v3105_v30  ;;  %v2185_v47 = vand.u32 2147483648, %v3888_v6 }
 0x1db   : > { %v2179_v33 = vsel %vm2177_vm14, %v2178_v21, %v2176_v31  ;;  %v2169_v34 = vsel %vm2168_vm15, %v3875_v52, %v2167_v28  ;;  %v3107_v37 = vpop.eup %3106 }
 0x1dc   : > { %v2209_v35 = vmax.f32 %v2179_v33, 1e-09  ;;  %v2172_v36 = vsel %vm2170_vm0, %v2171_v32, %v2169_v34  ;;  %v3109_v40 = vpop.eup %3108  ;;  %v2188_v41 = vmul.f32 %v3107_v37, %v3886_v5  ;;  %v2256_v3 = vmul.f32 0.3, %v2245_v42 }
 0x1dd   : > { %v2208_v38 = vmax.f32 %v2172_v36, 1e-09  ;;  %v2181_v44 = vmul.f32 %v3109_v40, %v3888_v6  ;;  %v3111_v45 = vpop.eup %3110 }
 0x1de   : > { %3122 = vlog2.f32 %v2209_v35  ;;  %v2190_v46 = vsel %vm2189_vm1, %v3886_v5, %v2188_v41  ;;  %v2262_v13 = vmul.f32 1.442695, %v2256_v3 }
 0x1df   : > { %3124 = vlog2.f32 %v2208_v38  ;;  %v3113_v48 = vpop.eup %3112  ;;  %v2183_v49 = vsel %vm2182_vm3, %v3888_v6, %v2181_v44  ;;  %v2193_v50 = vsel %vm2191_vm2, %v2192_v43, %v2190_v46  ;;  %v2251_v6 = vmul.f32 0.6931472, %v3111_v45 }
 0x1e0   : > { %v3115_v52 = vpop.eup %3114  ;;  %v2186_v53 = vsel %vm2184_vm4, %v2185_v47, %v2183_v49  ;;  %v2202_v54 = vmul.f32 %v3113_v48, %v3900_v18  ;;  %v2211_v55 = vmax.f32 %v2193_v50, 1e-09  ;;  %v2286_v50 = vlaneseq }
 0x1e1   : > { %v2210_v56 = vmax.f32 %v2186_v53, 1e-09  ;;  %v2195_v58 = vmul.f32 %v3115_v52, %v3902_v19  ;;  %v3117_v61 = vpop.eup %3116  ;;  %v2259_v17 = vmul.f32 0.3, %v2251_v6 }
 0x1e2   : > { %v2204_v59 = vsel %vm2203_vm5, %v3900_v18, %v2202_v54  ;;  %3126 = vlog2.f32 %v2211_v55  ;;  %v3119_v0 = vpop.eup %3118  ;;  %v2249_v8 = vmul.f32 0.6931472, %v3117_v61 }
 0x1e3   : > { %3128 = vlog2.f32 %v2210_v56  ;;  %v2197_v62 = vsel %vm2196_vm7, %v3902_v19, %v2195_v58  ;;  %v2207_v63 = vsel %vm2205_vm6, %v2206_v57, %v2204_v59  ;;  %v3121_v4 = vpop.eup %3120  ;;  %v2255_v16 = vmul.f32 0.6931472, %v3119_v0 }
 0x1e4   : > { %v2200_v1 = vsel %vm2198_vm8, %v2199_v60, %v2197_v62  ;;  %v2213_v2 = vmax.f32 %v2207_v63, 1e-09  ;;  %v2253_v19 = vmul.f32 0.6931472, %v3121_v4  ;;  %v2258_v15 = vmul.f32 0.3, %v2249_v8 }
 0x1e5   : > { %v2212_v5 = vmax.f32 %v2200_v1, 1e-09  ;;  %v2261_v20 = vmul.f32 0.3, %v2255_v16  ;;  %v2268_v27 = vmul.f32 1.442695, %v2259_v17 }
 0x1e6   : > { %3130 = vlog2.f32 %v2213_v2  ;;  %v2260_v28 = vmul.f32 0.3, %v2253_v19  ;;  %v2266_v29 = vmul.f32 1.442695, %v2258_v15  ;;  %v2287_v56 = vshrl.u32 %v2286_v50, 7 }
 0x1e7   : > { %3132 = vlog2.f32 %v2212_v5  ;;  %v2272_v36 = vmul.f32 1.442695, %v2261_v20 }
 0x1e8   : > { %v3123_v7 = vpop.eup %3122  ;;  %3134 = vpow2.f32 %v2264_v11  ;;  %v2270_v39 = vmul.f32 1.442695, %v2260_v28  ;;  %v2292_v1 = vadd.s32 40, %v2287_v56 }
 0x1e9   : > { %v3125_v9 = vpop.eup %3124  ;;  %v2217_v10 = vmul.f32 0.6931472, %v3123_v7  ;;  %3136 = vpow2.f32 %v2262_v13  ;;  %v3376_v13 = vmov 0.0  }
 0x1ea   : > { %v2215_v12 = vmul.f32 0.6931472, %v3125_v9  ;;  %vm2305_vm9 = vcmp.lt.s32.totalorder %v2292_v1, 47  ;;  %300 = vst [vmem:[%s295_s21] sm:$0x1] %v3376_v13 }
 0x1eb   : > { %v2227_v14 = vmul.f32 0.3, %v2217_v10 }
 0x1ec   : > { %v2226_v18 = vmul.f32 0.3, %v2215_v12  ;;  %v3127_v23 = vpop.eup %3126 }
 0x1ed   : > { %v2234_v22 = vmul.f32 1.442695, %v2227_v14  ;;  %v3129_v25 = vpop.eup %3128  ;;  %v2221_v26 = vmul.f32 0.6931472, %v3127_v23 }
 0x1ee   : > { %v2232_v24 = vmul.f32 1.442695, %v2226_v18  ;;  %v2219_v21 = vmul.f32 0.6931472, %v3129_v25 }
 0x1ef   : > { %3138 = vpow2.f32 %v2234_v22  ;;  %v2229_v30 = vmul.f32 0.3, %v2221_v26 }
 0x1f0   : > { %3140 = vpow2.f32 %v2232_v24  ;;  %v3131_v31 = vpop.eup %3130  ;;  %v2228_v32 = vmul.f32 0.3, %v2219_v21 }
 0x1f1   : > { %v3133_v33 = vpop.eup %3132  ;;  %v2225_v34 = vmul.f32 0.6931472, %v3131_v31  ;;  %v2238_v35 = vmul.f32 1.442695, %v2229_v30  ;;  %3142 = vpow2.f32 %v2268_v27  ;;  %v2312_v23 = vld [vmem:[%s295_s21] sm:$0x1] }
 0x1f2   : > { %v2223_v37 = vmul.f32 0.6931472, %v3133_v33  ;;  %v2236_v38 = vmul.f32 1.442695, %v2228_v32  ;;  %3144 = vpow2.f32 %v2266_v29  ;;  %v3135_v42 = vpop.eup %3134 }
 0x1f3   : > { %v2231_v40 = vmul.f32 0.3, %v2225_v34  ;;  %3146 = vpow2.f32 %v2238_v35  ;;  %v3137_v44 = vpop.eup %3136 }
 0x1f4   : > { %v2230_v41 = vmul.f32 0.3, %v2223_v37  ;;  %3148 = vpow2.f32 %v2236_v38 }
 0x1f5   : > { %v2242_v43 = vmul.f32 1.442695, %v2231_v40  ;;  %3150 = vpow2.f32 %v2272_v36 }
 0x1f6   : > { %v2240_v45 = vmul.f32 1.442695, %v2230_v41  ;;  %3152 = vpow2.f32 %v2270_v39 }
 0x1f7   : > { %3154 = vpow2.f32 %v2242_v43 }
 0x1f8   : > { %3156 = vpow2.f32 %v2240_v45 }
 0x1f9   : > { %v3139_v46 = vpop.eup %3138 }
 0x1fa   : > { %v3141_v47 = vpop.eup %3140  ;;  %v2275_v48 = vsub.f32 %v3139_v46, %v3135_v42 }
 0x1fb   : > { %v2274_v49 = vsub.f32 %v3141_v47, %v3137_v44  ;;  %v3143_v52 = vpop.eup %3142 }
 0x1fc   : > { %v2281_v51 = vmul.f32 %v2275_v48, %v2275_v48  ;;  %v3145_v54 = vpop.eup %3144 }
 0x1fd   : > { %v2280_v53 = vmul.f32 %v2274_v49, %v2274_v49  ;;  %v3147_v55 = vpop.eup %3146 }
 0x1fe   : > { %v3149_v58 = vpop.eup %3148  ;;  %v2277_v59 = vsub.f32 %v3147_v55, %v3143_v52 }
 0x1ff   : > { %v2313_v57 = vadd.f32 %v2281_v51, %v2280_v53  ;;  %v3151_v60 = vpop.eup %3150  ;;  %v2276_v61 = vsub.f32 %v3149_v58, %v3145_v54 }
 0x200   : > { %v3153_v62 = vpop.eup %3152  ;;  %v2283_v5 = vmul.f32 %v2277_v59, %v2277_v59 }
 0x201   : > { %v3155_v63 = vpop.eup %3154  ;;  %v2282_v0 = vmul.f32 %v2276_v61, %v2276_v61 }
 0x202   : > { %v3157_v2 = vpop.eup %3156  ;;  %v2279_v3 = vsub.f32 %v3155_v63, %v3151_v60 }
 0x203   : > { %v2278_v4 = vsub.f32 %v3157_v2, %v3153_v62  ;;  %v2314_v6 = vadd.f32 %v2313_v57, %v2282_v0 }
 0x204   : > { %v2285_v7 = vmul.f32 %v2279_v3, %v2279_v3 }
 0x205   : > { %v2284_v8 = vmul.f32 %v2278_v4, %v2278_v4  ;;  %v2315_v9 = vadd.f32 %v2314_v6, %v2283_v5 }
 0x206   : > { %v2311_v11 = vsel %vm2305_vm9, %v2285_v7, 0.0 }
 0x207   : > { %v2316_v10 = vadd.f32 %v2315_v9, %v2284_v8 }
 0x209   : > { %v2317_v12 = vadd.f32 %v2316_v10, %v2311_v11 }
 0x20b   : > { %2318 = vadd.xlane.f32.xlu0 %v2317_v12 }
 0x298   : > { %v2319_v14 = vpop.xlane.xlu0 %2318 }
 0x299   : > { %v2320_v16 = vrot.slane %v2319_v14, 4 }
 0x29b   : > { %v2321_v17 = vadd.f32 %v2320_v16, %v2319_v14 }
 0x29d   : > { %v2322_v18 = vrot.slane %v2321_v17, 2 }
 0x29f   : > { %v2323_v19 = vadd.f32 %v2322_v18, %v2321_v17 }
 0x2a1   : > { %v2324_v15 = vrot.slane %v2323_v19, 1 }
 0x2a3   : > { %v2325_v22 = vadd.f32 %v2324_v15, %v2323_v19 }
 0x2a5   : > { %2993 = vpush %v2325_v22 }
 0x2d6   : > { %s2994_s23 = spop %2993 }
 0x2d7   : > { %s2327_s6 = smul.f32 0.0012515645, %s2994_s23 }
 0x2d9   : > { %v2328_v24 = vstv %s2327_s6 }
 0x2da   : > { %v2329_v25 = vadd.f32 %v2328_v24, %v2312_v23 }
 0x2dc   : > { %2330 = vst [vmem:[%s295_s21] sm:$0x1] %v2329_v25 }
 0x2dd   : > { %3287 = shalt.err (!%p3284_p7)
}
 0x2de   : > { %s3288_s3 = scalar_lea.hbm %s3941_s22, 16  ;;  %s3292_s29 = scalar_lea.hbm %s3994_s4, 32 }
 0x2df   : > { %p3289_p11 = scmp.ne.s32.totalorder %s3941_s22, %s3288_s3  ;;  %p3293_p12 = scmp.lt.u32.totalorder %s3941_s22, %s3994_s4 }
 0x2e0   : > { %p3294_p13 = scmp.lt.u32.totalorder %s3292_s29, %s3288_s3  ;;  %p3296_p2 = scmp.lt.u32.totalorder %s3288_s3, %s3941_s22 }
 0x2e1   : > { %p3290_p1 = pnand %p3289_p11, %p4021_p6 }
 0x2e2   : > { %p3295_p0 = por %p3294_p13, %p3293_p12 }
 0x2e3   : > { %p3291_p8 = pneg %p3290_p1 }
 0x2e4   : > { %p3297_p10 = por %p3296_p2, %p3295_p0 }
 0x2e6   : > { %p3298_p3 = pnand %p3297_p10, %p3291_p8 }
 0x2e8   : > { %3301 = shalt.err (!%p3298_p3)
}
 0x2e9   : > { %3007 = dma.vmem_to_hbm [thread:$0]  (%p4021_p6), %s3943_s13, 16, %s3941_s22, %s2332_s30  }
 0x2ea PF: > { %s2356_s25 = sand.u32 1, %s3348_s15   ;;  %p4022_p4 = scmp.ne.s32.totalorder %s4005_s24, 0 }
 0x2eb   : > { %p4023_p9 = scmp.ge.s32.totalorder %s3368_s20, 2  ;;  %s2357_s21 = scalar_lea.sflag [#allocation4], %s2356_s25 }
 0x2ed   : > { %p3024_p5 = pnand %p4023_p9, %p4022_p4 }
 0x2ef   : > { %3343 = dma.done.wait (!%p3024_p5), %s2357_s21, 16  }
 0x2f0   : > { %3345 = vsyncadd (!%p3024_p5), %s2357_s21, 4294967280  ;;  %s24_s20 = sadd.s32 1, %s3368_s20   ;;  %s4024_s15 = smov %s3352_s16 }
 0x2f1   : > { %p21_p7 = scmp.ge.s32.totalorder %s24_s20, 4   ;;  %s4025_s16 = smov %s3356_s17 }
 0x2f2   : > { %s4026_s17 = smov %s3552_s7  ;;  %s4027_s18 = smov %s3364_s19 }
 0x2f3   : > { %s4028_s19 = smov %s4030_s28  ;;  %23 = sbr.rel (!%p21_p7) target bundleno = 13 (0xd), region = 114 }
 0x2fa   :  { %2361 = vsyncpa [#allocation3], 1 }
 0x2fb   :  { %2363 = vsyncpa [#allocation3 + $0x1], 1 }
 0x2fc   :  { %2364 = vsyncpa [#allocation6], 1 }
 0x2fd   :  { %2366 = vsyncpa [#allocation6 + $0x1], 1 }
 0x2fe   :  { %2367 = vsyncpa [#allocation9], 1 }
 0x2ff   :  { %2368 = vsyncpa [#allocation4], 1 }
 0x300   :  { %2370 = vsyncpa [#allocation4 + $0x1], 1 }

// kernel: multiscale_spectrogram_loss.3
= control target key start
LH: loop header
LB: loop body
LE: loop exit
PB: predicated region body
PF: predicated region fallthrough
CT: control target
= control target key end

     0   :  { %s3417_s0 = inlined_call_operand.hbm [shape: f32[2,27,16], index: 0, kind: input, shape index: {}]   ;;  %s3418_s1 = inlined_call_operand.hbm [shape: f32[2,27,16], index: 1, kind: input, shape index: {}]   ;;  %s3419_s2 = inlined_call_operand.hbm [shape: f32[64,128], index: 2, kind: input, shape index: {}]   ;;  %s3420_s3 = inlined_call_operand.hbm [shape: f32[64,128], index: 3, kind: input, shape index: {}]   ;;  %s3421_s4 = inlined_call_operand.hbm [shape: f32[2,1,128], index: 4, kind: output, shape index: {}]  }
   0x1   :  { %3431 = sst [smem:[#allocation18_spill]] %s3417_s0 }
   0x2   :  { %3432 = sst [smem:[#allocation19_spill]] %s3419_s2 }
   0x3   :  { %3433 = sst [smem:[#allocation20_spill]] %s3420_s3 }
   0x4   :  { %9 = vsyncpa [#allocation3], 0 }
   0x5   :  { %11 = vsyncpa [#allocation3 + $0x1], 0 }
   0x6   :  { %12 = vsyncpa [#allocation6], 0 }
   0x7   :  { %14 = vsyncpa [#allocation6 + $0x1], 0 }
   0x8   :  { %15 = vsyncpa [#allocation9], 0 }
   0x9   :  { %16 = vsyncpa [#allocation4], 0 }
   0xa   :  { %18 = vsyncpa [#allocation4 + $0x1], 0  ;;  %s2887_s15 = smov 0   ;;  %s2889_s16 = smov 0  }
   0xb   :  { %s2891_s17 = smov 0   ;;  %s2893_s18 = smov 0  }
   0xc   :  { %s2895_s19 = smov 0   ;;  %s2897_s20 = smov 0  }
   0xd LB: > { %3434 = sst [smem:[#allocation16_spill]] %s2846_s19  ;;  %s2918_s21 = sadd.s32 4294967295, %s2850_s20   ;;  %s2850_s20 = sphi %s2897_s20, %s24_s20   ;;  %s2846_s19 = sphi %s2895_s19, %s3457_s19   ;;  %s2842_s18 = sphi %s2893_s18, %s3456_s18   ;;  %s2838_s17 = sphi %s2891_s17, %s3460_s17   ;;  %s2834_s16 = sphi %s2889_s16, %s3459_s16   ;;  %s2830_s15 = sphi %s2887_s15, %s3458_s15  }
   0xe   : > { %s2014_s22 = sadd.s32 4294967294, %s2850_s20   ;;  %p56_p0 = scmp.ne.s32.totalorder %s2834_s16, %s2830_s15 }
   0xf   : > { %p3422_p1 = scmp.eq.s32.totalorder %s2918_s21, 0  ;;  %p154_p3 = scmp.eq.s32.totalorder %s2014_s22, 1 }
  0x10   : > { %p2015_p5 = scmp.ge.s32.totalorder %s2850_s20, 1  ;;  %p161_p7 = scmp.lt.s32.totalorder %s2850_s20, 3 }
  0x11   : > { %p2927_p4 = por %p3422_p1, %p56_p0  ;;  %p2932_p6 = por %p154_p3, %p56_p0 }
  0x12   : > { %p2937_p8 = pnand %p2015_p5, %p161_p7  ;;  %s2852_s26 = smov [#allocation7]  }
  0x13   : > { %s3435_s23 = scalar_select %p2927_p4, 1, 0 }
  0x14   : > { %s3436_s24 = scalar_select %p2932_p6, 1, 0 }
  0x15   : > { %s173_s27 = sshll.u32 %s2852_s26, 4  ;;  %p2525_p9 = pneg %p2937_p8  ;;  %s2941_s27 = int_to_ptr.vmem [resolvable:$true] %s173_s27 }
  0x16   : > { %s2853_s29 = smov [#allocation8]   ;;  %s3439_s2 = sld [smem:[#allocation19_spill]] }
  0x17   : > { %p2948_p11 = pnand %p2525_p9, %p3422_p1  ;;  %s186_s30 = sshll.u32 %s2853_s29, 4  ;;  %s2952_s30 = int_to_ptr.vmem [resolvable:$true] %s186_s30 }
  0x19   : > { %p2642_p13 = pneg %p2948_p11 }
  0x1c   : > { %s2640_s7 = scalar_lea.hbm %s3439_s2, 1024 }
  0x1d   : > { %p2641_p12 = scmp.ne.s32.totalorder %s3439_s2, %s2640_s7  ;;  %p2647_p5 = scmp.lt.u32.totalorder %s2640_s7, %s3439_s2 }
  0x1f   : > { %p2643_p0 = pnand %p2642_p13, %p2641_p12 }
  0x21   : > { %p2644_p3 = pneg %p2643_p0 }
  0x23   : > { %p2649_p7 = pnand %p2647_p5, %p2644_p3 }
  0x25   : > { %2652 = shalt.err (!%p2649_p7)
}
  0x26   : > { %s2653_s12 = scalar_lea.vmem %s2941_s27, 1024  ;;  %p2661_p2 = scmp.lt.s32.totalorder %s2941_s27, %s2941_s27 }
  0x27   : > { %p2654_p9 = scmp.ne.s32.totalorder %s2941_s27, %s2653_s12  ;;  %p2662_p12 = scmp.lt.s32.totalorder %s2653_s12, %s2653_s12 }
  0x29   : > { %p2656_p10 = pnand %p2654_p9, %p2642_p13  ;;  %p2663_p0 = por %p2662_p12, %p2661_p2 }
  0x2b   : > { %p2657_p1 = pneg %p2656_p10 }
  0x2d   : > { %p2664_p6 = pnand %p2663_p0, %p2657_p1 }
  0x2f   : > { %2667 = shalt.err (!%p2664_p6)
}
  0x30   : > { %s3423_s13 = smov 128   ;;  %s3425_s14 = smov 8  }
  0x31   : > { %2528 = dma.hbm_to_vmem [thread:$0]  (!%p2948_p11), %s3439_s2, 1024, %s2941_s27, [#allocation6], %s3423_s13, %s3423_s13, %s3425_s14  }
  0x32   : > { %s3440_s3 = sld [smem:[#allocation20_spill]] }
  0x38   : > { %s2668_s6 = scalar_lea.hbm %s3440_s3, 1024 }
  0x39   : > { %p2669_p1 = scmp.ne.s32.totalorder %s3440_s3, %s2668_s6  ;;  %p2675_p10 = scmp.lt.u32.totalorder %s2668_s6, %s3440_s3 }
  0x3b   : > { %p2671_p2 = pnand %p2669_p1, %p2642_p13 }
  0x3d   : > { %p2672_p6 = pneg %p2671_p2 }
  0x3f   : > { %p2677_p3 = pnand %p2675_p10, %p2672_p6 }
  0x41   : > { %2680 = shalt.err (!%p2677_p3)
}
  0x42   : > { %s2681_s27 = scalar_lea.vmem %s2952_s30, 1024  ;;  %p2689_p12 = scmp.lt.s32.totalorder %s2952_s30, %s2952_s30 }
  0x43   : > { %p2682_p5 = scmp.ne.s32.totalorder %s2952_s30, %s2681_s27  ;;  %p2690_p0 = scmp.lt.s32.totalorder %s2681_s27, %s2681_s27 }
  0x45   : > { %p2684_p7 = pnand %p2682_p5, %p2642_p13  ;;  %p2691_p1 = por %p2690_p0, %p2689_p12 }
  0x47   : > { %p2685_p9 = pneg %p2684_p7 }
  0x49   : > { %p2692_p2 = pnand %p2691_p1, %p2685_p9 }
  0x4b   : > { %2695 = shalt.err (!%p2692_p2)
}
  0x4c   : > { %2531 = dma.hbm_to_vmem [thread:$0]  (!%p2948_p11), %s3440_s3, 1024, %s2952_s30, [#allocation9], %s3423_s13, %s3423_s13, %s3425_s14  }
  0x4d   : > { %s36_s28 = sadd.s32 1, %s2846_s19  ;;  %s43_s22 = sadd.s32 1, %s2838_s17 }
  0x4e   : > { %p38_p13 = scmp.ge.s32.totalorder %s36_s28, 2  ;;  %p50_p6 = scmp.ne.s32.totalorder %s2838_s17, %s2834_s16 }
  0x4f   : > { %p51_p10 = scmp.eq.s32.totalorder %s2850_s20, 0  ;;  %p2545_p3 = scmp.lt.s32.totalorder %s2850_s20, 2 }
  0x50   : > { %s3462_s28 = smov (%p38_p13, %s36_s28), 0  ;;  %p3442_p7 = scmp.eq.s32.totalorder %s2918_s21, 1 }
  0x51   : > { %3441 = sst [smem:[#allocation17_spill]] %s3462_s28  ;;  %p52_p5 = por %p51_p10, %p50_p6 }
  0x52   : > { %p3022_p9 = por %p3442_p7, %p50_p6  ;;  %s40_s29 = ssub.s32 %s2846_s19, %s3462_s28 }
  0x53   : > { %s200_s5 = sand.u32 1, %s2838_s17   ;;  %p41_p12 = scmp.eq.s32.totalorder %s40_s29, 0 }
  0x54   : > { %s3443_s26 = scalar_select %p3022_p9, 1, 0 }
  0x55   : > { %s3029_s30 = sshll.u32 %s200_s5, 5  ;;  %s2099_s6 = sshll.u32 %s2846_s19, 9 }
  0x56   : > { %s3033_s7 = scalar_select %p41_p12, %s2838_s17, %s43_s22  }
  0x57   : > { %s3444_s0 = sld [smem:[#allocation18_spill]]  ;;  %s204_s27 = scalar_lea.vmem [#allocation2], %s3029_s30 }
  0x58   : > { %s211_s11 = sshll.u32 %s204_s27, 4  ;;  %p3043_p11 = pnand %p2545_p3, %p52_p5  ;;  %s3047_s11 = int_to_ptr.vmem [resolvable:$true] %s211_s11 }
  0x59   : > { %s3052_s8 = scalar_lea.hbm %s3418_s1, %s2099_s6  ;;  %s3054_s9 = scalar_lea.sflag [#allocation3], %s200_s5 }
  0x5a   : > { %p2698_p1 = pneg %p3043_p11 }
  0x5d   : > { %s3038_s10 = scalar_lea.hbm %s3444_s0, %s2099_s6  ;;  %s2701_s2 = scalar_lea.hbm %s3444_s0, 1024 }
  0x5e   : > { %s2696_s13 = scalar_lea.hbm %s3038_s10, 512  ;;  %p2702_p6 = scmp.lt.u32.totalorder %s3038_s10, %s3444_s0 }
  0x5f   : > { %p2697_p0 = scmp.ne.s32.totalorder %s3038_s10, %s2696_s13  ;;  %p2703_p10 = scmp.lt.u32.totalorder %s2701_s2, %s2696_s13 }
  0x60   : > { %p2705_p5 = scmp.lt.u32.totalorder %s2696_s13, %s3038_s10 }
  0x61   : > { %p2699_p2 = pnand %p2698_p1, %p2697_p0  ;;  %p2704_p3 = por %p2703_p10, %p2702_p6 }
  0x63   : > { %p2700_p13 = pneg %p2699_p2  ;;  %p2706_p7 = por %p2705_p5, %p2704_p3 }
  0x65   : > { %p2707_p12 = pnand %p2706_p7, %p2700_p13 }
  0x67   : > { %2710 = shalt.err (!%p2707_p12)
}
  0x68   : > { %s2711_s5 = scalar_lea.vmem %s3047_s11, 512  ;;  %s2856_s14 = smov [#allocation2]  }
  0x69   : > { %p2712_p0 = scmp.ne.s32.totalorder %s3047_s11, %s2711_s5  ;;  %s2716_s6 = sshll.u32 %s2856_s14, 4  ;;  %s2717_s6 = int_to_ptr.vmem [resolvable:$false] %s2716_s6 }
  0x6a   : > { %s2718_s3 = scalar_lea.vmem %s2717_s6, 1024  ;;  %p2719_p4 = scmp.lt.s32.totalorder %s3047_s11, %s2717_s6 }
  0x6b   : > { %p2714_p2 = pnand %p2712_p0, %p2698_p1  ;;  %p2720_p6 = scmp.lt.s32.totalorder %s2718_s3, %s2711_s5 }
  0x6d   : > { %p2715_p9 = pneg %p2714_p2  ;;  %p2721_p10 = por %p2720_p6, %p2719_p4 }
  0x6f   : > { %p2722_p3 = pnand %p2721_p10, %p2715_p9 }
  0x71   : > { %2725 = shalt.err (!%p2722_p3)
}
  0x72   : > { %s3446_s2 = smov 8   ;;  %s3447_s13 = smov 128  }
  0x73   : > { %2535 = dma.hbm_to_vmem [thread:$0]  (!%p3043_p11), %s3038_s10, 512, %s3047_s11, %s3054_s9, %s3447_s13, %s3447_s13, %s3446_s2  }
  0x74   : > { %s225_s28 = scalar_lea.vmem [#allocation5], %s3029_s30  ;;  %s221_s29 = sand.u32 1, %s2850_s20  }
  0x75   : > { %s232_s22 = sshll.u32 %s225_s28, 4  ;;  %s3089_s27 = scalar_lea.sflag [#allocation6], %s221_s29  ;;  %s3087_s22 = int_to_ptr.vmem [resolvable:$true] %s232_s22 }
  0x76   : > { %s2726_s5 = scalar_lea.hbm %s3052_s8, 512  ;;  %s2731_s3 = scalar_lea.hbm %s3418_s1, 1024 }
  0x77   : > { %p2727_p4 = scmp.ne.s32.totalorder %s3052_s8, %s2726_s5  ;;  %p2732_p5 = scmp.lt.u32.totalorder %s3052_s8, %s3418_s1 }
  0x78   : > { %p2733_p7 = scmp.lt.u32.totalorder %s2731_s3, %s2726_s5  ;;  %p2735_p0 = scmp.lt.u32.totalorder %s2726_s5, %s3052_s8 }
  0x79   : > { %p2729_p9 = pnand %p2727_p4, %p2698_p1 }
  0x7a   : > { %p2734_p12 = por %p2733_p7, %p2732_p5 }
  0x7b   : > { %p2730_p13 = pneg %p2729_p9 }
  0x7c   : > { %p2736_p2 = por %p2735_p0, %p2734_p12 }
  0x7e   : > { %p2737_p6 = pnand %p2736_p2, %p2730_p13 }
  0x80   : > { %2740 = shalt.err (!%p2737_p6)
}
  0x81   : > { %s2741_s30 = scalar_lea.vmem %s3087_s22, 512  ;;  %s2857_s10 = smov [#allocation5]  }
  0x82   : > { %p2742_p10 = scmp.ne.s32.totalorder %s3087_s22, %s2741_s30  ;;  %s2746_s11 = sshll.u32 %s2857_s10, 4  ;;  %s2747_s11 = int_to_ptr.vmem [resolvable:$false] %s2746_s11 }
  0x83   : > { %s2748_s0 = scalar_lea.vmem %s2747_s11, 1024  ;;  %p2749_p9 = scmp.lt.s32.totalorder %s3087_s22, %s2747_s11 }
  0x84   : > { %p2744_p3 = pnand %p2742_p10, %p2698_p1  ;;  %p2750_p5 = scmp.lt.s32.totalorder %s2748_s0, %s2741_s30 }
  0x86   : > { %p2745_p4 = pneg %p2744_p3  ;;  %p2751_p7 = por %p2750_p5, %p2749_p9 }
  0x88   : > { %p2752_p12 = pnand %p2751_p7, %p2745_p4 }
  0x8a   : > { %2755 = shalt.err (!%p2752_p12)
}
  0x8b   : > { %2538 = dma.hbm_to_vmem [thread:$0]  (!%p3043_p11), %s3052_s8, 512, %s3087_s22, %s3089_s27, %s3447_s13, %s3447_s13, %s3446_s2  }
  0x8c   : > { %244 = sbr.rel (%p2937_p8) target bundleno = 747 (0x2eb), region = 36  ;;  %s3121_s19 = sand.u32 (!%p2937_p8), 1, %s2834_s16  }
  0x8d   : > { %s2026_s9 = sshll.u32 (!%p2937_p8), %s3121_s19, 5  ;;  %s247_s28 = scalar_lea.sflag (!%p2937_p8), [#allocation3], %s3121_s19 }
  0x8e   : > { %s3125_s29 = scalar_lea.vmem (!%p2937_p8), [#allocation2], %s2026_s9  ;;  %p3448_p1 = scmp.ne.s32.totalorder (!%p2937_p8), %s3435_s23, 0 }
  0x93   : > { %2809 = dma.done.wait (%p3448_p1), %s247_s28, 512  }
  0x94   : > { %2811 = vsyncadd (%p3448_p1), %s247_s28, 4294966784  ;;  %s255_s12 = sand.u32 1, %s2918_s21   ;;  %s3132_s8 = scalar_lea.vmem [#allocation5], %s2026_s9 }
  0x95   : > { %s256_s25 = scalar_lea.sflag [#allocation6], %s255_s12 }
  0x96   : > { %2813 = dma.done.wait (%p3448_p1), %s256_s25, 512  }
  0x97   : > { %2815 = vsyncadd (%p3448_p1), %s256_s25, 4294966784  ;;  %p3449_p8 = scmp.eq.s32.totalorder %s2918_s21, 0 }
  0x99   : > { %2817 = dma.done.wait (%p3449_p8), [#allocation6], 1024   ;;  %p3450_p11 = pmov %p3449_p8 }
  0x9a   : > { %p3451_p13 = pmov %p3449_p8 }
  0x9b   : > { %2819 = vsyncadd (%p3450_p11), [#allocation6], 4294966272 }
  0x9c   : > { %2821 = dma.done.wait (%p3451_p13), [#allocation9], 1024   ;;  %p3452_p0 = pmov %p3449_p8 }
  0x9d   : > { %v2858_v0 = vmov 0.0|0.0   ;;  %vm2859_vm0 = vmmov 0   ;;  %v2860_v1 = vmov 0.0   ;;  %v315_v2 = vld [vmem:[#allocation7 + $0x10] sm:$0xff]  ;;  %v316_v3 = vld [vmem:[#allocation7 + $0x18] sm:$0xff]  ;;  %v306_v7 = vld [vmem:[#allocation7] sm:$0xff] }
  0x9e   : > { %2823 = vsyncadd (%p3452_p0), [#allocation9], 4294966272  ;;  %2389 = vmatprep.subr.bf16.mxu0 %v2858_v0  ;;  %2395 = vmatprep.subr.bf16.mxu1 %v2858_v0  ;;  %v496_v4 = vld [vmem:[#allocation8 + $0x10] sm:$0xff]  ;;  %v3152_v5 = vpack.c.bf16 %v316_v3, %v315_v2  ;;  %v497_v6 = vld [vmem:[#allocation8 + $0x18] sm:$0xff]  ;;  %vm317_vm1 = vcmask 130048   ;;  %s295_s21 = scalar_lea.vmem [#allocation10], %s3121_s19 }
  0x9f   : > { %2185 = vmatprep.mubr.msk.f32.mxu0 %vm2859_vm0, %v2860_v1  ;;  %2211 = vmatprep.mubr.msk.f32.mxu1 %vm2859_vm0, %v2860_v1  ;;  %v3154_v8 = vpack.c.bf16 %v497_v6, %v496_v4  ;;  %v307_v9 = vld [vmem:[#allocation7 + $0x8] sm:$0xff]  ;;  %v308_v10 = vld [vmem:[#allocation8] sm:$0xff]  ;;  %v2032_v16 = vld [vmem:[%s3125_s29 + $0x11] sm:$0xff]  ;;  %300 = vst [vmem:[%s295_s21] sm:$0x1] %v2860_v1  ;;  %s2096_s2 = sshll.u32 %s2842_s18, 4  ;;  %s1875_s22 = sshll.u32 %s295_s21, 4  ;;  %s3370_s22 = int_to_ptr.vmem [resolvable:$true] %s1875_s22 }
  0xa0   : > { %v309_v11 = vld [vmem:[#allocation8 + $0x8] sm:$0xff]  ;;  %2391 = vmatpush3.bf16.msra.mxu0 %v3152_v5  ;;  %v3158_v13 = vpack.c.bf16 %v307_v9, %v306_v7  ;;  %v663_v17 = vld [vmem:[#allocation7 + $0x20] sm:$0xff]  ;;  %v305_v25 = vld [vmem:[%s3125_s29 + $0x10] sm:$0xff]  ;;  %s3368_s14 = scalar_lea.hbm %s3421_s4, %s2096_s2  ;;  %s1863_s6 = scalar_lea.sflag [#allocation4], %s3121_s19 }
  0xa1   : > { %v2030_v12 = vld [vmem:[%s3125_s29 + $0x1] sm:$0xff]  ;;  %2397 = vmatpush3.bf16.msra.mxu1 %v3154_v8  ;;  %2392 = vmatprep.subr.bf16.mxu0 %v2858_v0  ;;  %v3162_v14 = vpack.c.bf16 %v309_v11, %v308_v10  ;;  %v2031_v15 = vld [vmem:[%s3125_s29 + $0x9] sm:$0xff]  ;;  %v848_v27 = vld [vmem:[#allocation7 + $0x38] sm:$0xff]  ;;  %s2756_s3 = scalar_lea.vmem %s3370_s22, 16  ;;  %p3453_p6 = scmp.ne.s32.totalorder %s3443_s26, 0 }
  0xa2   : > { %2398 = vmatprep.subr.bf16.mxu1 %v2858_v0  ;;  %v664_v18 = vld [vmem:[#allocation7 + $0x28] sm:$0xff]  ;;  %v757_v19 = vld [vmem:[#allocation8 + $0x20] sm:$0xff]  ;;  %v847_v26 = vld [vmem:[#allocation7 + $0x30] sm:$0xff]  ;;  %p2757_p2 = scmp.ne.s32.totalorder %s3370_s22, %s2756_s3  ;;  %s2861_s18 = smov [#allocation10]  }
  0xa3   : > { %2186 = vmatmul.mubr.msk.f32.vlgmr.msra.gmra.mrb[0].mxu0 %vm317_vm1, %v2030_v12  ;;  %v758_v20 = vld [vmem:[#allocation8 + $0x28] sm:$0xff]  ;;  %v303_v21 = vld [vmem:[%s3125_s29] sm:$0xff]  ;;  %v3188_v22 = vpack.c.bf16 %v664_v18, %v663_v17  ;;  %v941_v28 = vld [vmem:[#allocation8 + $0x30] sm:$0xff]  ;;  %v3217_v31 = vpack.c.bf16 %v848_v27, %v847_v26  ;;  %s2760_s30 = sshll.u32 %s2861_s18, 4  ;;  %s2761_s30 = int_to_ptr.vmem [resolvable:$false] %s2760_s30 }
  0xa4   : > { %2212 = vmatmul.mubr.msk.f32.vlgmr.msra.gmra.mrb[0].mxu1 %vm317_vm1, %v2030_v12  ;;  %2394 = vmatpush3.bf16.msra.mxu0 %v3158_v13  ;;  %v3192_v23 = vpack.c.bf16 %v758_v20, %v757_v19  ;;  %v304_v24 = vld [vmem:[%s3125_s29 + $0x8] sm:$0xff]  ;;  %v942_v29 = vld [vmem:[#allocation8 + $0x38] sm:$0xff]  ;;  %v1060_v41 = vld [vmem:[%s3132_s8] sm:$0xff]  ;;  %p2758_p10 = pnand %p2757_p2, %p3453_p6  ;;  %s2762_s10 = scalar_lea.vmem %s2761_s30, 32 }
  0xa5   : > { %2400 = vmatpush3.bf16.msra.mxu1 %v3162_v14  ;;  %2188 = vmatprep.mubr.msk.f32.mxu0 %vm2859_vm0, %v2860_v1  ;;  %v2045_v30 = vld [vmem:[%s3125_s29 + $0x2] sm:$0xff]  ;;  %v3221_v32 = vpack.c.bf16 %v942_v29, %v941_v28  ;;  %v2046_v33 = vld [vmem:[%s3125_s29 + $0xa] sm:$0xff]  ;;  %v2047_v34 = vld [vmem:[%s3125_s29 + $0x12] sm:$0xff]  ;;  %p2763_p4 = scmp.lt.s32.totalorder %s3370_s22, %s2761_s30  ;;  %p2764_p9 = scmp.lt.s32.totalorder %s2762_s10, %s2756_s3 }
  0xa6   : > { %2214 = vmatprep.mubr.msk.f32.mxu1 %vm2859_vm0, %v2860_v1  ;;  %2401 = vmatprep.subr.bf16.mxu0 %v2858_v0  ;;  %v2054_v35 = vld [vmem:[%s3125_s29 + $0x3] sm:$0xff]  ;;  %v2055_v36 = vld [vmem:[%s3125_s29 + $0xb] sm:$0xff]  ;;  %v2056_v37 = vld [vmem:[%s3125_s29 + $0x13] sm:$0xff]  ;;  %p2759_p3 = pneg %p2758_p10 }
  0xa7   : > { %2189 = vmatmul.mubr.msk.f32.gmra.mrb[2].mxu0 %vm317_vm1, %v2031_v15  ;;  %2404 = vmatprep.subr.bf16.mxu1 %v2858_v0  ;;  %v2063_v38 = vld [vmem:[%s3132_s8 + $0x1] sm:$0xff]  ;;  %v2064_v39 = vld [vmem:[%s3132_s8 + $0x9] sm:$0xff]  ;;  %v2065_v40 = vld [vmem:[%s3132_s8 + $0x11] sm:$0xff]  ;;  %p2765_p5 = por %p2764_p9, %p2763_p4 }
  0xa8   : > { %2215 = vmatmul.mubr.msk.f32.gmra.mrb[2].mxu1 %vm317_vm1, %v2031_v15  ;;  %2191 = vmatprep.mubr.msk.f32.mxu0 %vm2859_vm0, %v2860_v1  ;;  %v1061_v42 = vld [vmem:[%s3132_s8 + $0x8] sm:$0xff]  ;;  %v1062_v43 = vld [vmem:[%s3132_s8 + $0x10] sm:$0xff] }
  0xa9   : > { %2217 = vmatprep.mubr.msk.f32.mxu1 %vm2859_vm0, %v2860_v1  ;;  %v2078_v44 = vld [vmem:[%s3132_s8 + $0x2] sm:$0xff]  ;;  %v2079_v45 = vld [vmem:[%s3132_s8 + $0xa] sm:$0xff]  ;;  %v2080_v46 = vld [vmem:[%s3132_s8 + $0x12] sm:$0xff]  ;;  %p2766_p7 = pnand %p2765_p5, %p2759_p3 }
  0xaa   : > { %v2087_v47 = vld [vmem:[%s3132_s8 + $0x3] sm:$0xff]  ;;  %v2088_v48 = vld [vmem:[%s3132_s8 + $0xb] sm:$0xff]  ;;  %v2089_v49 = vld [vmem:[%s3132_s8 + $0x13] sm:$0xff] }
  0xab   : > { %2192 = vmatmul.mubr.msk.f32.gmra.mrb[4].mxu0 %vm317_vm1, %v2032_v16 }
  0xac   : > { %2218 = vmatmul.mubr.msk.f32.gmra.mrb[4].mxu1 %vm317_vm1, %v2032_v16  ;;  %2198 = vmatprep.mubr.msk.f32.mxu0 %vm2859_vm0, %v2860_v1 }
  0xad   : > { %2224 = vmatprep.mubr.msk.f32.mxu1 %vm2859_vm0, %v2860_v1 }
  0xaf   : > { %2199 = vmatmul.mubr.msk.f32.vlgmr.msra.gmra.mrb[0].mxu0 %vm317_vm1, %v303_v21 }
  0xb0   : > { %2225 = vmatmul.mubr.msk.f32.vlgmr.msra.gmra.mrb[0].mxu1 %vm317_vm1, %v303_v21  ;;  %2403 = vmatpush3.bf16.msra.mxu0 %v3188_v22 }
  0xb1   : > { %2406 = vmatpush3.bf16.msra.mxu1 %v3192_v23  ;;  %2201 = vmatprep.mubr.msk.f32.mxu0 %vm2859_vm0, %v2860_v1 }
  0xb2   : > { %2227 = vmatprep.mubr.msk.f32.mxu1 %vm2859_vm0, %v2860_v1  ;;  %2407 = vmatprep.subr.bf16.mxu0 %v2858_v0 }
  0xb3   : > { %2202 = vmatmul.mubr.msk.f32.gmra.mrb[2].mxu0 %vm317_vm1, %v304_v24  ;;  %2410 = vmatprep.subr.bf16.mxu1 %v2858_v0 }
  0xb4   : > { %2228 = vmatmul.mubr.msk.f32.gmra.mrb[2].mxu1 %vm317_vm1, %v304_v24  ;;  %2204 = vmatprep.mubr.msk.f32.mxu0 %vm2859_vm0, %v2860_v1 }
  0xb5   : > { %2230 = vmatprep.mubr.msk.f32.mxu1 %vm2859_vm0, %v2860_v1 }
  0xb7   : > { %2205 = vmatmul.mubr.msk.f32.gmra.mrb[4].mxu0 %vm317_vm1, %v305_v25 }
  0xb8   : > { %2231 = vmatmul.mubr.msk.f32.gmra.mrb[4].mxu1 %vm317_vm1, %v305_v25  ;;  %2237 = vmatprep.mubr.msk.f32.mxu0 %vm2859_vm0, %v2860_v1 }
  0xb9   : > { %2250 = vmatprep.mubr.msk.f32.mxu1 %vm2859_vm0, %v2860_v1 }
  0xbb   : > { %2238 = vmatmul.mubr.msk.f32.vlgmr.msra.gmra.mrb[0].mxu0 %vm317_vm1, %v2045_v30 }
  0xbc   : > { %2251 = vmatmul.mubr.msk.f32.vlgmr.msra.gmra.mrb[0].mxu1 %vm317_vm1, %v2045_v30  ;;  %2409 = vmatpush3.bf16.msra.mxu0 %v3217_v31 }
  0xbd   : > { %2412 = vmatpush3.bf16.msra.mxu1 %v3221_v32  ;;  %2240 = vmatprep.mubr.msk.f32.mxu0 %vm2859_vm0, %v2860_v1 }
  0xbe   : > { %2253 = vmatprep.mubr.msk.f32.mxu1 %vm2859_vm0, %v2860_v1  ;;  %2413 = vmatprep.subr.bf16.mxu0 %v2858_v0 }
  0xbf   : > { %2241 = vmatmul.mubr.msk.f32.gmra.mrb[2].mxu0 %vm317_vm1, %v2046_v33  ;;  %2419 = vmatprep.subr.bf16.mxu1 %v2858_v0 }
  0xc0   : > { %2254 = vmatmul.mubr.msk.f32.gmra.mrb[2].mxu1 %vm317_vm1, %v2046_v33  ;;  %2243 = vmatprep.mubr.msk.f32.mxu0 %vm2859_vm0, %v2860_v1 }
  0xc1   : > { %2256 = vmatprep.mubr.msk.f32.mxu1 %vm2859_vm0, %v2860_v1 }
  0xc3   : > { %2244 = vmatmul.mubr.msk.f32.gmra.mrb[4].mxu0 %vm317_vm1, %v2047_v34 }
  0xc4   : > { %2257 = vmatmul.mubr.msk.f32.gmra.mrb[4].mxu1 %vm317_vm1, %v2047_v34  ;;  %2263 = vmatprep.mubr.msk.f32.mxu0 %vm2859_vm0, %v2860_v1 }
  0xc5   : > { %2276 = vmatprep.mubr.msk.f32.mxu1 %vm2859_vm0, %v2860_v1 }
  0xc7   : > { %2264 = vmatmul.mubr.msk.f32.vlgmr.msra.gmra.mrb[0].mxu0 %vm317_vm1, %v2054_v35 }
  0xc8   : > { %2277 = vmatmul.mubr.msk.f32.vlgmr.msra.gmra.mrb[0].mxu1 %vm317_vm1, %v2054_v35  ;;  %2415 = vmatpush3.bf16.msra.mxu0 %v3152_v5 }
  0xc9   : > { %2421 = vmatpush3.bf16.msra.mxu1 %v3154_v8  ;;  %2266 = vmatprep.mubr.msk.f32.mxu0 %vm2859_vm0, %v2860_v1 }
  0xca   : > { %2279 = vmatprep.mubr.msk.f32.mxu1 %vm2859_vm0, %v2860_v1  ;;  %2416 = vmatprep.subr.bf16.mxu0 %v2858_v0 }
  0xcb   : > { %2267 = vmatmul.mubr.msk.f32.gmra.mrb[2].mxu0 %vm317_vm1, %v2055_v36  ;;  %2422 = vmatprep.subr.bf16.mxu1 %v2858_v0 }
  0xcc   : > { %2280 = vmatmul.mubr.msk.f32.gmra.mrb[2].mxu1 %vm317_vm1, %v2055_v36  ;;  %2269 = vmatprep.mubr.msk.f32.mxu0 %vm2859_vm0, %v2860_v1 }
  0xcd   : > { %2282 = vmatprep.mubr.msk.f32.mxu1 %vm2859_vm0, %v2860_v1 }
  0xcf   : > { %2270 = vmatmul.mubr.msk.f32.gmra.mrb[4].mxu0 %vm317_vm1, %v2056_v37 }
  0xd0   : > { %2283 = vmatmul.mubr.msk.f32.gmra.mrb[4].mxu1 %vm317_vm1, %v2056_v37  ;;  %2289 = vmatprep.mubr.msk.f32.mxu0 %vm2859_vm0, %v2860_v1 }
  0xd1   : > { %2315 = vmatprep.mubr.msk.f32.mxu1 %vm2859_vm0, %v2860_v1 }
  0xd3   : > { %2290 = vmatmul.mubr.msk.f32.vlgmr.msra.gmra.mrb[6].mxu0 %vm317_vm1, %v2063_v38 }
  0xd4   : > { %2316 = vmatmul.mubr.msk.f32.vlgmr.msra.gmra.mrb[6].mxu1 %vm317_vm1, %v2063_v38  ;;  %2418 = vmatpush3.bf16.msra.mxu0 %v3158_v13 }
  0xd5   : > { %2424 = vmatpush3.bf16.msra.mxu1 %v3162_v14  ;;  %2292 = vmatprep.mubr.msk.f32.mxu0 %vm2859_vm0, %v2860_v1 }
  0xd6   : > { %2318 = vmatprep.mubr.msk.f32.mxu1 %vm2859_vm0, %v2860_v1  ;;  %2425 = vmatprep.subr.bf16.mxu0 %v2858_v0 }
  0xd7   : > { %2293 = vmatmul.mubr.msk.f32.gmra.mrb[8].mxu0 %vm317_vm1, %v2064_v39  ;;  %2428 = vmatprep.subr.bf16.mxu1 %v2858_v0 }
  0xd8   : > { %2319 = vmatmul.mubr.msk.f32.gmra.mrb[8].mxu1 %vm317_vm1, %v2064_v39  ;;  %2295 = vmatprep.mubr.msk.f32.mxu0 %vm2859_vm0, %v2860_v1 }
  0xd9   : > { %2321 = vmatprep.mubr.msk.f32.mxu1 %vm2859_vm0, %v2860_v1 }
  0xdb   : > { %2296 = vmatmul.mubr.msk.f32.gmra.mrb[10].mxu0 %vm317_vm1, %v2065_v40 }
  0xdc   : > { %2322 = vmatmul.mubr.msk.f32.gmra.mrb[10].mxu1 %vm317_vm1, %v2065_v40  ;;  %2302 = vmatprep.mubr.msk.f32.mxu0 %vm2859_vm0, %v2860_v1 }
  0xdd   : > { %2328 = vmatprep.mubr.msk.f32.mxu1 %vm2859_vm0, %v2860_v1 }
  0xdf   : > { %2303 = vmatmul.mubr.msk.f32.vlgmr.msra.gmra.mrb[6].mxu0 %vm317_vm1, %v1060_v41 }
  0xe0   : > { %2329 = vmatmul.mubr.msk.f32.vlgmr.msra.gmra.mrb[6].mxu1 %vm317_vm1, %v1060_v41  ;;  %2427 = vmatpush3.bf16.msra.mxu0 %v3188_v22 }
  0xe1   : > { %2430 = vmatpush3.bf16.msra.mxu1 %v3192_v23  ;;  %2305 = vmatprep.mubr.msk.f32.mxu0 %vm2859_vm0, %v2860_v1 }
  0xe2   : > { %2331 = vmatprep.mubr.msk.f32.mxu1 %vm2859_vm0, %v2860_v1  ;;  %2431 = vmatprep.subr.bf16.mxu0 %v2858_v0 }
  0xe3   : > { %2306 = vmatmul.mubr.msk.f32.gmra.mrb[8].mxu0 %vm317_vm1, %v1061_v42  ;;  %2434 = vmatprep.subr.bf16.mxu1 %v2858_v0 }
  0xe4   : > { %2332 = vmatmul.mubr.msk.f32.gmra.mrb[8].mxu1 %vm317_vm1, %v1061_v42  ;;  %2308 = vmatprep.mubr.msk.f32.mxu0 %vm2859_vm0, %v2860_v1 }
  0xe5   : > { %2334 = vmatprep.mubr.msk.f32.mxu1 %vm2859_vm0, %v2860_v1 }
  0xe7   : > { %2309 = vmatmul.mubr.msk.f32.gmra.mrb[10].mxu0 %vm317_vm1, %v1062_v43 }
  0xe8   : > { %2335 = vmatmul.mubr.msk.f32.gmra.mrb[10].mxu1 %vm317_vm1, %v1062_v43  ;;  %2341 = vmatprep.mubr.msk.f32.mxu0 %vm2859_vm0, %v2860_v1 }
  0xe9   : > { %2354 = vmatprep.mubr.msk.f32.mxu1 %vm2859_vm0, %v2860_v1 }
  0xeb   : > { %2342 = vmatmul.mubr.msk.f32.vlgmr.msra.gmra.mrb[6].mxu0 %vm317_vm1, %v2078_v44 }
  0xec   : > { %2355 = vmatmul.mubr.msk.f32.vlgmr.msra.gmra.mrb[6].mxu1 %vm317_vm1, %v2078_v44  ;;  %2433 = vmatpush3.bf16.msra.mxu0 %v3217_v31 }
  0xed   : > { %2436 = vmatpush3.bf16.msra.mxu1 %v3221_v32  ;;  %2344 = vmatprep.mubr.msk.f32.mxu0 %vm2859_vm0, %v2860_v1 }
  0xee   : > { %2357 = vmatprep.mubr.msk.f32.mxu1 %vm2859_vm0, %v2860_v1 }
  0xef   : > { %2345 = vmatmul.mubr.msk.f32.gmra.mrb[8].mxu0 %vm317_vm1, %v2079_v45 }
  0xf0   : > { %2358 = vmatmul.mubr.msk.f32.gmra.mrb[8].mxu1 %vm317_vm1, %v2079_v45  ;;  %2347 = vmatprep.mubr.msk.f32.mxu0 %vm2859_vm0, %v2860_v1 }
  0xf1   : > { %2360 = vmatprep.mubr.msk.f32.mxu1 %vm2859_vm0, %v2860_v1 }
  0xf3   : > { %2348 = vmatmul.mubr.msk.f32.gmra.mrb[10].mxu0 %vm317_vm1, %v2080_v46 }
  0xf4   : > { %2361 = vmatmul.mubr.msk.f32.gmra.mrb[10].mxu1 %vm317_vm1, %v2080_v46  ;;  %2367 = vmatprep.mubr.msk.f32.mxu0 %vm2859_vm0, %v2860_v1 }
  0xf5   : > { %2380 = vmatprep.mubr.msk.f32.mxu1 %vm2859_vm0, %v2860_v1 }
  0xf7   : > { %2368 = vmatmul.mubr.msk.f32.vlgmr.msra.gmra.mrb[6].mxu0 %vm317_vm1, %v2087_v47 }
  0xf8   : > { %2381 = vmatmul.mubr.msk.f32.vlgmr.msra.gmra.mrb[6].mxu1 %vm317_vm1, %v2087_v47  ;;  %2370 = vmatprep.mubr.msk.f32.mxu0 %vm2859_vm0, %v2860_v1 }
  0xf9   : > { %2383 = vmatprep.mubr.msk.f32.mxu1 %vm2859_vm0, %v2860_v1 }
  0xfb   : > { %2371 = vmatmul.mubr.msk.f32.gmra.mrb[8].mxu0 %vm317_vm1, %v2088_v48 }
  0xfc   : > { %2384 = vmatmul.mubr.msk.f32.gmra.mrb[8].mxu1 %vm317_vm1, %v2088_v48  ;;  %2373 = vmatprep.mubr.msk.f32.mxu0 %vm2859_vm0, %v2860_v1 }
  0xfd   : > { %2386 = vmatprep.mubr.msk.f32.mxu1 %vm2859_vm0, %v2860_v1 }
  0xff   : > { %2374 = vmatmul.mubr.msk.f32.gmra.mrb[10].mxu0 %vm317_vm1, %v2089_v49 }
 0x100   : > { %2387 = vmatmul.mubr.msk.f32.gmra.mrb[10].mxu1 %vm317_vm1, %v2089_v49 }
 0x19a   : > { %v924_v50 = vpop.f32.mrb[0].mxu0 }
 0x19b   : > { %v1026_v51 = vmul.f32 %v924_v50, %v924_v50  ;;  %v1009_v52 = vpop.f32.mrb[0].mxu1  ;;  %v2265_v53 = vpop.f32.mrb[1].mxu0 }
 0x19c   : > { %v1029_v54 = vmul.f32 %v1009_v52, %v1009_v52  ;;  %v2278_v55 = vpop.f32.mrb[1].mxu1 }
 0x19e   : > { %v1032_v56 = vadd.f32 %v1029_v54, %v1026_v51  ;;  %v929_v57 = vpop.f32.mrb[2].mxu0 }
 0x19f   : > { %v1027_v58 = vmul.f32 %v929_v57, %v929_v57  ;;  %v1014_v59 = vpop.f32.mrb[2].mxu1  ;;  %v2268_v60 = vpop.f32.mrb[3].mxu0 }
 0x1a0   : > { %v2281_v61 = vpop.f32.mrb[3].mxu1  ;;  %v1030_v62 = vmul.f32 %v1014_v59, %v1014_v59  ;;  %2604 = vrsqrt.f32 %v1032_v56  ;;  %vm1037_vm2 = vcmp.eq.f32.partialorder %v1032_v56, inf  ;;  %v1040_v18 = vand.u32 2147483648, %v1032_v56 }
 0x1a1   : > { %vm1039_vm3 = vcmp.eq.f32.partialorder %v1032_v56, 0.0 }
 0x1a2   : > { %v934_v63 = vpop.f32.mrb[4].mxu0  ;;  %v1033_v0 = vadd.f32 %v1030_v62, %v1027_v58 }
 0x1a3   : > { %v1028_v2 = vmul.f32 %v934_v63, %v934_v63  ;;  %v1019_v3 = vpop.f32.mrb[4].mxu1  ;;  %v2271_v4 = vpop.f32.mrb[5].mxu0 }
 0x1a4   : > { %v1031_v5 = vmul.f32 %v1019_v3, %v1019_v3  ;;  %v2284_v6 = vpop.f32.mrb[5].mxu1  ;;  %2606 = vrsqrt.f32 %v1033_v0  ;;  %vm1044_vm4 = vcmp.eq.f32.partialorder %v1033_v0, inf  ;;  %v1047_v37 = vand.u32 2147483648, %v1033_v0 }
 0x1a5   : > { %vm1046_vm5 = vcmp.eq.f32.partialorder %v1033_v0, 0.0 }
 0x1a6   : > { %v1034_v7 = vadd.f32 %v1031_v5, %v1028_v2 }
 0x1a8   : > { %2608 = vrsqrt.f32 %v1034_v7  ;;  %vm1051_vm6 = vcmp.eq.f32.partialorder %v1034_v7, inf  ;;  %v1054_v43 = vand.u32 2147483648, %v1034_v7  ;;  %vm1053_vm7 = vcmp.eq.f32.partialorder %v1034_v7, 0.0 }
 0x1aa   : > { %v2605_v8 = vpop.eup %2604 }
 0x1ab   : > { %v1036_v9 = vmul.f32 %v2605_v8, %v1032_v56 }
 0x1ad   : > { %v1038_v17 = vsel %vm1037_vm2, %v1032_v56, %v1036_v9 }
 0x1ae   : > { %v2607_v14 = vpop.eup %2606  ;;  %v1041_v27 = vsel %vm1039_vm3, %v1040_v18, %v1038_v17 }
 0x1af   : > { %v1043_v22 = vmul.f32 %v2607_v14, %v1033_v0  ;;  %v1056_v36 = vmax.f32 %v1041_v27, 1e-09 }
 0x1b1   : > { %v1045_v31 = vsel %vm1044_vm4, %v1033_v0, %v1043_v22 }
 0x1b2   : > { %v2609_v21 = vpop.eup %2608  ;;  %v1048_v42 = vsel %vm1046_vm5, %v1047_v37, %v1045_v31 }
 0x1b3   : > { %v1050_v29 = vmul.f32 %v2609_v21, %v1034_v7  ;;  %v1057_v45 = vmax.f32 %v1048_v42, 1e-09 }
 0x1b5   : > { %v1052_v40 = vsel %vm1051_vm6, %v1034_v7, %v1050_v29 }
 0x1b6   : > { %v1055_v44 = vsel %vm1053_vm7, %v1054_v43, %v1052_v40 }
 0x1b7   : > { %v1058_v49 = vmax.f32 %v1055_v44, 1e-09 }
 0x1ca   : > { %v1663_v10 = vpop.f32.mrb[6].mxu0 }
 0x1cb   : > { %v1763_v11 = vmul.f32 %v1663_v10, %v1663_v10  ;;  %v1746_v12 = vpop.f32.mrb[6].mxu1  ;;  %v2369_v13 = vpop.f32.mrb[7].mxu0 }
 0x1cc   : > { %v1766_v15 = vmul.f32 %v1746_v12, %v1746_v12  ;;  %v2382_v16 = vpop.f32.mrb[7].mxu1 }
 0x1ce   : > { %v1769_v19 = vadd.f32 %v1766_v15, %v1763_v11  ;;  %v1668_v20 = vpop.f32.mrb[8].mxu0 }
 0x1cf   : > { %v1764_v23 = vmul.f32 %v1668_v20, %v1668_v20  ;;  %v1751_v24 = vpop.f32.mrb[8].mxu1  ;;  %v2372_v25 = vpop.f32.mrb[9].mxu0 }
 0x1d0   : > { %2610 = vrsqrt.f32 %v1769_v19  ;;  %v2385_v26 = vpop.f32.mrb[9].mxu1  ;;  %v1767_v28 = vmul.f32 %v1751_v24, %v1751_v24  ;;  %vm1774_vm8 = vcmp.eq.f32.partialorder %v1769_v19, inf  ;;  %v1777_v48 = vand.u32 2147483648, %v1769_v19 }
 0x1d1   : > { %vm1776_vm9 = vcmp.eq.f32.partialorder %v1769_v19, 0.0  ;;  %v1832_v26 = vlaneseq }
 0x1d2   : > { %v1673_v30 = vpop.f32.mrb[10].mxu0  ;;  %v1770_v32 = vadd.f32 %v1767_v28, %v1764_v23 }
 0x1d3   : > { %v1765_v33 = vmul.f32 %v1673_v30, %v1673_v30  ;;  %v1756_v34 = vpop.f32.mrb[10].mxu1  ;;  %v2375_v35 = vpop.f32.mrb[11].mxu0  ;;  %v1833_v30 = vshrl.u32 %v1832_v26, 7 }
 0x1d4   : > { %v1768_v38 = vmul.f32 %v1756_v34, %v1756_v34  ;;  %v2388_v39 = vpop.f32.mrb[11].mxu1  ;;  %2612 = vrsqrt.f32 %v1770_v32  ;;  %vm1781_vm10 = vcmp.eq.f32.partialorder %v1770_v32, inf  ;;  %v1784_v56 = vand.u32 2147483648, %v1770_v32 }
 0x1d5   : > { %2614 = vlog2.f32 %v1056_v36  ;;  %vm1783_vm11 = vcmp.eq.f32.partialorder %v1770_v32, 0.0  ;;  %v1835_v34 = vadd.s32 16, %v1833_v30 }
 0x1d6   : > { %v1771_v41 = vadd.f32 %v1768_v38, %v1765_v33 }
 0x1d7   : > { %vm1842_vm14 = vcmp.lt.s32.totalorder %v1835_v34, 22 }
 0x1d8   : > { %2616 = vrsqrt.f32 %v1771_v41  ;;  %vm1788_vm12 = vcmp.eq.f32.partialorder %v1771_v41, inf  ;;  %v1791_v61 = vand.u32 2147483648, %v1771_v41  ;;  %vm1790_vm13 = vcmp.eq.f32.partialorder %v1771_v41, 0.0 }
 0x1d9   : > { %2618 = vlog2.f32 %v1057_v45 }
 0x1da   : > { %v2611_v46 = vpop.eup %2610  ;;  %2620 = vlog2.f32 %v1058_v49 }
 0x1db   : > { %v1773_v47 = vmul.f32 %v2611_v46, %v1769_v19 }
 0x1dd   : > { %v1775_v50 = vsel %vm1774_vm8, %v1769_v19, %v1773_v47 }
 0x1de   : > { %v1778_v51 = vsel %vm1776_vm9, %v1777_v48, %v1775_v50  ;;  %v2613_v52 = vpop.eup %2612 }
 0x1df   : > { %v1793_v53 = vmax.f32 %v1778_v51, 1e-09  ;;  %v1780_v54 = vmul.f32 %v2613_v52, %v1770_v32  ;;  %v2615_v55 = vpop.eup %2614  ;;  %v1846_v51 = vld [vmem:[%s295_s21] sm:$0x1] }
 0x1e0   : > { %v1812_v0 = vmul.f32 0.6931472, %v2615_v55 }
 0x1e1   : > { %2622 = vlog2.f32 %v1793_v53  ;;  %v1782_v58 = vsel %vm1781_vm10, %v1770_v32, %v1780_v54 }
 0x1e2   : > { %v2617_v57 = vpop.eup %2616  ;;  %v1785_v60 = vsel %vm1783_vm11, %v1784_v56, %v1782_v58  ;;  %v1817_v5 = vmul.f32 0.3, %v1812_v0 }
 0x1e3   : > { %v1787_v59 = vmul.f32 %v2617_v57, %v1771_v41  ;;  %v1794_v62 = vmax.f32 %v1785_v60, 1e-09  ;;  %v2619_v3 = vpop.eup %2618 }
 0x1e4   : > { %v2621_v6 = vpop.eup %2620  ;;  %v1814_v7 = vmul.f32 0.6931472, %v2619_v3  ;;  %v1820_v11 = vmul.f32 1.442695, %v1817_v5 }
 0x1e5   : > { %v1789_v63 = vsel %vm1788_vm12, %v1771_v41, %v1787_v59  ;;  %2624 = vlog2.f32 %v1794_v62  ;;  %v1816_v10 = vmul.f32 0.6931472, %v2621_v6 }
 0x1e6   : > { %v1792_v2 = vsel %vm1790_vm13, %v1791_v61, %v1789_v63  ;;  %v1818_v13 = vmul.f32 0.3, %v1814_v7 }
 0x1e7   : > { %v1795_v4 = vmax.f32 %v1792_v2, 1e-09  ;;  %v1819_v17 = vmul.f32 0.3, %v1816_v10 }
 0x1e8   : > { %v1822_v18 = vmul.f32 1.442695, %v1818_v13 }
 0x1e9   : > { %2626 = vlog2.f32 %v1795_v4  ;;  %v1824_v23 = vmul.f32 1.442695, %v1819_v17 }
 0x1ea   : > { %2628 = vpow2.f32 %v1820_v11 }
 0x1eb   : > { %v2623_v8 = vpop.eup %2622 }
 0x1ec   : > { %v1797_v9 = vmul.f32 0.6931472, %v2623_v8 }
 0x1ee   : > { %v1802_v12 = vmul.f32 0.3, %v1797_v9 }
 0x1ef   : > { %v2625_v14 = vpop.eup %2624 }
 0x1f0   : > { %v1805_v15 = vmul.f32 1.442695, %v1802_v12  ;;  %v1799_v16 = vmul.f32 0.6931472, %v2625_v14 }
 0x1f2   : > { %2630 = vpow2.f32 %v1805_v15  ;;  %v1803_v20 = vmul.f32 0.3, %v1799_v16 }
 0x1f3   : > { %v2627_v19 = vpop.eup %2626  ;;  %2632 = vpow2.f32 %v1822_v18 }
 0x1f4   : > { %v1801_v21 = vmul.f32 0.6931472, %v2627_v19  ;;  %v1807_v22 = vmul.f32 1.442695, %v1803_v20  ;;  %v2629_v27 = vpop.eup %2628 }
 0x1f6   : > { %v1804_v24 = vmul.f32 0.3, %v1801_v21  ;;  %2634 = vpow2.f32 %v1807_v22 }
 0x1f7   : > { %2636 = vpow2.f32 %v1824_v23 }
 0x1f8   : > { %v1809_v25 = vmul.f32 1.442695, %v1804_v24 }
 0x1fa   : > { %2638 = vpow2.f32 %v1809_v25 }
 0x1fc   : > { %v2631_v28 = vpop.eup %2630 }
 0x1fd   : > { %v1826_v29 = vsub.f32 %v2631_v28, %v2629_v27  ;;  %v2633_v31 = vpop.eup %2632 }
 0x1ff   : > { %v1829_v37 = vmul.f32 %v1826_v29, %v1826_v29 }
 0x200   : > { %v2635_v32 = vpop.eup %2634 }
 0x201   : > { %v1827_v33 = vsub.f32 %v2635_v32, %v2633_v31  ;;  %v2637_v35 = vpop.eup %2636 }
 0x203   : > { %v1830_v38 = vmul.f32 %v1827_v33, %v1827_v33 }
 0x204   : > { %v2639_v36 = vpop.eup %2638 }
 0x205   : > { %v1828_v39 = vsub.f32 %v2639_v36, %v2637_v35  ;;  %v1847_v40 = vadd.f32 %v1830_v38, %v1829_v37 }
 0x207   : > { %v1831_v41 = vmul.f32 %v1828_v39, %v1828_v39 }
 0x209   : > { %v1845_v42 = vsel %vm1842_vm14, %v1831_v41, 0.0 }
 0x20a   : > { %v1848_v43 = vadd.f32 %v1847_v40, %v1845_v42 }
 0x20c   : > { %1849 = vadd.xlane.f32.xlu0 %v1848_v43 }
 0x299   : > { %v1850_v44 = vpop.xlane.xlu0 %1849 }
 0x29a   : > { %v1851_v45 = vrot.slane %v1850_v44, 4 }
 0x29c   : > { %v1852_v46 = vadd.f32 %v1851_v45, %v1850_v44 }
 0x29e   : > { %v1853_v47 = vrot.slane %v1852_v46, 2 }
 0x2a0   : > { %v1854_v48 = vadd.f32 %v1853_v47, %v1852_v46 }
 0x2a2   : > { %v1855_v49 = vrot.slane %v1854_v48, 1 }
 0x2a4   : > { %v1856_v50 = vadd.f32 %v1855_v49, %v1854_v48 }
 0x2a6   : > { %2509 = vpush %v1856_v50 }
 0x2d7   : > { %s2510_s23 = spop %2509 }
 0x2d8   : > { %s1858_s13 = smul.f32 0.0013774105, %s2510_s23 }
 0x2da   : > { %v1859_v52 = vstv %s1858_s13 }
 0x2db   : > { %v1860_v53 = vadd.f32 %v1859_v52, %v1846_v51 }
 0x2dd   : > { %1861 = vst [vmem:[%s295_s21] sm:$0x1] %v1860_v53 }
 0x2de   : > { %2769 = shalt.err (!%p2766_p7)
}
 0x2df   : > { %s2770_s11 = scalar_lea.hbm %s3368_s14, 16  ;;  %s2774_s9 = scalar_lea.hbm %s3421_s4, 32 }
 0x2e0   : > { %p2771_p12 = scmp.ne.s32.totalorder %s3368_s14, %s2770_s11  ;;  %p2775_p11 = scmp.lt.u32.totalorder %s3368_s14, %s3421_s4 }
 0x2e1   : > { %p2776_p13 = scmp.lt.u32.totalorder %s2774_s9, %s2770_s11  ;;  %p2778_p2 = scmp.lt.u32.totalorder %s2770_s11, %s3368_s14 }
 0x2e2   : > { %p2772_p1 = pnand %p2771_p12, %p3453_p6 }
 0x2e3   : > { %p2777_p0 = por %p2776_p13, %p2775_p11 }
 0x2e4   : > { %p2773_p8 = pneg %p2772_p1 }
 0x2e5   : > { %p2779_p10 = por %p2778_p2, %p2777_p0 }
 0x2e7   : > { %p2780_p3 = pnand %p2779_p10, %p2773_p8 }
 0x2e9   : > { %2783 = shalt.err (!%p2780_p3)
}
 0x2ea   : > { %2523 = dma.vmem_to_hbm [thread:$0]  (%p3453_p6), %s3370_s22, 16, %s3368_s14, %s1863_s6  }
 0x2eb PF: > { %s1887_s12 = sand.u32 1, %s2830_s15   ;;  %p3454_p4 = scmp.ne.s32.totalorder %s3436_s24, 0 }
 0x2ec   : > { %p3455_p9 = scmp.ge.s32.totalorder %s2850_s20, 2  ;;  %s1888_s25 = scalar_lea.sflag [#allocation4], %s1887_s12 }
 0x2ee   : > { %p2540_p5 = pnand %p3455_p9, %p3454_p4 }
 0x2f0   : > { %2825 = dma.done.wait (!%p2540_p5), %s1888_s25, 16  }
 0x2f1   : > { %2827 = vsyncadd (!%p2540_p5), %s1888_s25, 4294967280  ;;  %s24_s20 = sadd.s32 1, %s2850_s20   ;;  %s3456_s18 = sld [smem:[#allocation16_spill]] }
 0x2f2   : > { %p21_p7 = scmp.ge.s32.totalorder %s24_s20, 4   ;;  %s3457_s19 = sld [smem:[#allocation17_spill]] }
 0x2f3   : > { %s3458_s15 = smov %s2834_s16  ;;  %s3459_s16 = smov %s2838_s17 }
 0x2f4   : > { %s3460_s17 = smov %s3033_s7  ;;  %23 = sbr.rel (!%p21_p7) target bundleno = 13 (0xd), region = 114 }
 0x2fb   :  { %1892 = vsyncpa [#allocation3], 1 }
 0x2fc   :  { %1894 = vsyncpa [#allocation3 + $0x1], 1 }
 0x2fd   :  { %1895 = vsyncpa [#allocation6], 1 }
 0x2fe   :  { %1897 = vsyncpa [#allocation6 + $0x1], 1 }
 0x2ff   :  { %1898 = vsyncpa [#allocation9], 1 }
 0x300   :  { %1899 = vsyncpa [#allocation4], 1 }
 0x301   :  { %1901 = vsyncpa [#allocation4 + $0x1], 1 }

</bundles_post_ra>
